<compile_context>
chip_gen: v7x
topology: tpu7x:2x2x1
jax: 0.10.0
libtpu: 0.0.40
codegen_flags: <defaults>
</compile_context>

<pallas_src>
import math
from functools import partial

import jax
import jax.numpy as jnp
from jax.experimental import pallas as pl
from jax.experimental.pallas import tpu as pltpu


# ----------------------------- tiling helper --------------------------------

def _tile(dim, pref):
    """Largest tile <= pref that evenly divides dim (halving search), else the
    full dim. For v5e prefer pref=128; for v6e/v7x 256 (MXU is 256-wide)."""
    if dim <= pref:
        return dim
    t = pref
    while t >= 8:
        if dim % t == 0:
            return t
        t //= 2
    # TODO(synk): ragged dims (e.g. vocab=50257) fall back to a full-dim block;
    # a padded / cdiv grid would be needed for the real GPT-2 vocab size.
    return dim


# ------------------------- plain tiled linear (K-accum) ----------------------

def _linear_kernel(x_ref, w_ref, b_ref, o_ref, acc_ref):
    @pl.when(pl.program_id(2) == 0)
    def _():
        acc_ref[...] = jnp.zeros_like(acc_ref)

    acc_ref[...] += jnp.dot(
        x_ref[...].astype(jnp.bfloat16),
        w_ref[...].astype(jnp.bfloat16),
        preferred_element_type=jnp.float32,
    )

    @pl.when(pl.program_id(2) == pl.num_programs(2) - 1)
    def _():
        o_ref[...] = (acc_ref[...] + b_ref[...]).astype(o_ref.dtype)


def linear(x2d, w, b, *, tm=256, tn=256, tk=512):
    M, K = x2d.shape
    K2, N = w.shape
    assert K == K2
    tm, tn, tk = _tile(M, tm), _tile(N, tn), _tile(K, tk)
    return pl.pallas_call(
        _linear_kernel,
        out_shape=jax.ShapeDtypeStruct((M, N), jnp.float32),
        grid=(M // tm, N // tn, K // tk),
        in_specs=[
            pl.BlockSpec((tm, tk), lambda i, j, k: (i, k)),
            pl.BlockSpec((tk, tn), lambda i, j, k: (k, j)),
            pl.BlockSpec((1, tn), lambda i, j, k: (0, j)),
        ],
        out_specs=pl.BlockSpec((tm, tn), lambda i, j, k: (i, j)),
        scratch_shapes=[pltpu.VMEM((tm, tn), jnp.float32)],
        compiler_params=pltpu.CompilerParams(
            dimension_semantics=("parallel", "parallel", "arbitrary")
        ),
    )(x2d, w, b.reshape(1, N))


# ------------------ fused LayerNorm + linear (+ GELU epilogue) ---------------

def _make_ln_linear_kernel(activation, has_bias):
    def kernel(x_ref, g_ref, beta_ref, w_ref, *rest):
        if has_bias:
            bias_ref, o_ref = rest
        else:
            (o_ref,) = rest
        # LayerNorm in f32 on the VPU (full K per tile).
        x = x_ref[...]
        mu = jnp.mean(x, axis=-1, keepdims=True)
        var = jnp.mean((x - mu) ** 2, axis=-1, keepdims=True)
        h = (x - mu) * jax.lax.rsqrt(var + 1e-5) * g_ref[...] + beta_ref[...]
        # bf16 operands -> MXU, f32 accumulation.
        y = jnp.dot(
            h.astype(jnp.bfloat16),
            w_ref[...].astype(jnp.bfloat16),
            preferred_element_type=jnp.float32,
        )
        if has_bias:
            y = y + bias_ref[...]
        if activation == "gelu":
            c = math.sqrt(2.0 / math.pi)
            y = 0.5 * y * (1.0 + jnp.tanh(c * (y + 0.044715 * y * y * y)))
        o_ref[...] = y.astype(o_ref.dtype)

    return kernel


def ln_linear(x2d, gamma, beta, w, b=None, *, activation=None, tm=256, tn=256):
    M, C = x2d.shape
    C2, N = w.shape
    assert C == C2
    tm, tn = _tile(M, tm), _tile(N, tn)
    has_bias = b is not None
    in_specs = [
        pl.BlockSpec((tm, C), lambda i, j: (i, 0)),
        pl.BlockSpec((1, C), lambda i, j: (0, 0)),
        pl.BlockSpec((1, C), lambda i, j: (0, 0)),
        pl.BlockSpec((C, tn), lambda i, j: (0, j)),
    ]
    args = [x2d, gamma.reshape(1, C), beta.reshape(1, C), w]
    if has_bias:
        in_specs.append(pl.BlockSpec((1, tn), lambda i, j: (0, j)))
        args.append(b.reshape(1, N))
    return pl.pallas_call(
        _make_ln_linear_kernel(activation, has_bias),
        out_shape=jax.ShapeDtypeStruct((M, N), jnp.float32),
        grid=(M // tm, N // tn),
        in_specs=in_specs,
        out_specs=pl.BlockSpec((tm, tn), lambda i, j: (i, j)),
        compiler_params=pltpu.CompilerParams(
            dimension_semantics=("parallel", "parallel")
        ),
    )(*args)


# ---------------------- flash-style causal attention -------------------------

def _attn_kernel(q_ref, k_ref, v_ref, o_ref, m_sc, l_sc, acc_sc,
                 *, n_head, d_head, tq, tkv):
    qi = pl.program_id(1)
    kvi = pl.program_id(2)
    n_kv = pl.num_programs(2)
    scale = 1.0 / math.sqrt(d_head)

    @pl.when(kvi == 0)
    def _():
        m_sc[...] = jnp.full_like(m_sc, -1e30)
        l_sc[...] = jnp.zeros_like(l_sc)
        acc_sc[...] = jnp.zeros_like(acc_sc)

    q_start = qi * tq
    kv_start = kvi * tkv

    # Skip KV tiles that are entirely above the causal diagonal.
    @pl.when(kv_start <= q_start + (tq - 1))
    def _():
        row = q_start + jax.lax.broadcasted_iota(jnp.int32, (tq, tkv), 0)
        col = kv_start + jax.lax.broadcasted_iota(jnp.int32, (tq, tkv), 1)
        causal = col <= row

        q = q_ref[0].astype(jnp.bfloat16)   # (tq,  C) — heads packed on lanes
        k = k_ref[0].astype(jnp.bfloat16)   # (tkv, C)
        v = v_ref[0].astype(jnp.bfloat16)   # (tkv, C)

        for h in range(n_head):             # static unroll over heads
            sl = slice(h * d_head, (h + 1) * d_head)
            # Contract the head dim directly (no k.T / XLU transpose).
            s = jax.lax.dot_general(
                q[:, sl], k[:, sl],
                dimension_numbers=(((1,), (1,)), ((), ())),
                preferred_element_type=jnp.float32,
            ) * scale
            s = jnp.where(causal, s, -1e30)

            m_prev = m_sc[h]
            m_new = jnp.maximum(m_prev, jnp.max(s, axis=-1, keepdims=True))
            alpha = jnp.exp(m_prev - m_new)
            p = jnp.exp(s - m_new)
            l_sc[h] = alpha * l_sc[h] + jnp.sum(p, axis=-1, keepdims=True)
            acc_sc[h] = alpha * acc_sc[h] + jnp.dot(
                p.astype(jnp.bfloat16), v[:, sl],
                preferred_element_type=jnp.float32)
            m_sc[h] = m_new

    @pl.when(kvi == n_kv - 1)
    def _():
        parts = []
        for h in range(n_head):
            inv = pl.reciprocal(l_sc[h], approx=True)     # EUP, off the VALU
            parts.append(acc_sc[h] * inv)
        # Single lane-dense (tq, C) store — heads already merged.
        o_ref[0] = jnp.concatenate(parts, axis=-1).astype(o_ref.dtype)


def causal_attention(q, k, v, n_head, *, tq=256, tkv=256):
    # q, k, v: (B, T, C) with heads packed along C. Output: (B, T, C).
    B, T, C = q.shape
    d_head = C // n_head
    tq, tkv = _tile(T, tq), _tile(T, tkv)
    kernel = partial(_attn_kernel, n_head=n_head, d_head=d_head, tq=tq, tkv=tkv)
    return pl.pallas_call(
        kernel,
        out_shape=jax.ShapeDtypeStruct((B, T, C), jnp.float32),
        grid=(B, T // tq, T // tkv),
        in_specs=[
            pl.BlockSpec((1, tq, C), lambda b, i, j: (b, i, 0)),
            pl.BlockSpec((1, tkv, C), lambda b, i, j: (b, j, 0)),
            pl.BlockSpec((1, tkv, C), lambda b, i, j: (b, j, 0)),
        ],
        out_specs=pl.BlockSpec((1, tq, C), lambda b, i, j: (b, i, 0)),
        scratch_shapes=[
            pltpu.VMEM((n_head, tq, 1), jnp.float32),        # running max m
            pltpu.VMEM((n_head, tq, 1), jnp.float32),        # running sum l
            pltpu.VMEM((n_head, tq, d_head), jnp.float32),   # output accum
        ],
        compiler_params=pltpu.CompilerParams(
            dimension_semantics=("parallel", "parallel", "arbitrary")
        ),
    )(q, k, v)


# ------------------------------ GPT forward ----------------------------------

def block_forward(p, x, n_head):
    B, T, C = x.shape
    x2 = x.reshape(B * T, C)

    # Attention branch: LN1 fused into the QKV projection.
    qkv = ln_linear(x2, p["ln1_g"], p["ln1_b"], p["attn_w"], p["attn_b"])
    qkv = qkv.reshape(B, T, 3 * C)
    q, k, v = jnp.split(qkv, 3, axis=-1)           # heads stay packed along C
    y = causal_attention(q, k, v, n_head)          # (B, T, C), heads merged
    y = linear(y.reshape(B * T, C), p["proj_w"], p["proj_b"])
    x = x + y.reshape(B, T, C)

    # MLP branch: LN2 + fc + GELU fused; c_proj as K-accumulated matmul.
    h = ln_linear(x.reshape(B * T, C), p["ln2_g"], p["ln2_b"],
                  p["fc_w"], p["fc_b"], activation="gelu")
    h = linear(h, p["cproj_w"], p["cproj_b"])
    x = x + h.reshape(B, T, C)
    return x


def gpt_forward(params, idx, n_head):
    B, T = idx.shape
    wte = params["wte"]                    # (V, C), tied with lm_head
    wpe = params["wpe"]                    # (block_size, C)
    V, C = wte.shape

    x = wte[idx] + wpe[:T][None, :, :]     # embedding gather + pos add (glue)
    for blk in params["blocks"]:
        x = block_forward(blk, x, n_head)

    # Final LN fused into the (pre-transposed, tied) lm_head matmul; no bias,
    # vocab tiled along the lane axis.
    logits = ln_linear(x.reshape(B * T, C), params["lnf_g"], params["lnf_b"],
                       params["lm_head_w"], None, tn=512)
    return logits.reshape(B, T, V)
    # TODO(synk): cross-entropy loss path (targets is not None) not implemented.


# --------------------------- parameter creation ------------------------------

def init_params(key, *, n_layer, n_head, n_embd, vocab_size, block_size):
    std = 0.02
    proj_std = 0.02 * (2 * n_layer) ** -0.5
    keys = iter(jax.random.split(key, 4 + 8 * n_layer))

    def nrm(shape, s):
        return s * jax.random.normal(next(keys), shape, jnp.float32)

    wte = nrm((vocab_size, n_embd), std)
    params = {
        "wte": wte,
        # Tied lm_head weight materialized ONCE as (C, V) — no per-forward
        # wte.T transpose in HBM. (Re-derive if wte is ever updated.)
        "lm_head_w": wte.T,
        "wpe": nrm((block_size, n_embd), std),
        "lnf_g": jnp.ones((n_embd,), jnp.float32),
        "lnf_b": jnp.zeros((n_embd,), jnp.float32),
        "blocks": [],
    }
    for _ in range(n_layer):
        blk = {
            "ln1_g": jnp.ones((n_embd,), jnp.float32),
            "ln1_b": jnp.zeros((n_embd,), jnp.float32),
            "attn_w": nrm((n_embd, 3 * n_embd), std),
            "attn_b": jnp.zeros((3 * n_embd,), jnp.float32),
            "proj_w": nrm((n_embd, n_embd), proj_std),
            "proj_b": jnp.zeros((n_embd,), jnp.float32),
            "ln2_g": jnp.ones((n_embd,), jnp.float32),
            "ln2_b": jnp.zeros((n_embd,), jnp.float32),
            "fc_w": nrm((n_embd, 4 * n_embd), std),
            "fc_b": jnp.zeros((4 * n_embd,), jnp.float32),
            "cproj_w": nrm((4 * n_embd, n_embd), proj_std),
            "cproj_b": jnp.zeros((n_embd,), jnp.float32),
        }
        params["blocks"].append(blk)
    return params


# ------------------------------ reference (JAX) -------------------------------
# Mirrors the kernels' mixed precision (bf16 matmul operands, f32 accumulation)
# so the correctness check can use a tight tolerance.

def ref_forward(params, idx, n_head):
    B, T = idx.shape
    wte, wpe = params["wte"], params["wpe"]
    V, C = wte.shape
    Dh = C // n_head

    def mm(a, b):
        return jnp.dot(a.astype(jnp.bfloat16), b.astype(jnp.bfloat16),
                       preferred_element_type=jnp.float32)

    def ln(x, g, b):
        mu = x.mean(-1, keepdims=True)
        var = ((x - mu) ** 2).mean(-1, keepdims=True)
        return (x - mu) * jax.lax.rsqrt(var + 1e-5) * g + b

    def gelu(x):
        c = math.sqrt(2.0 / math.pi)
        return 0.5 * x * (1.0 + jnp.tanh(c * (x + 0.044715 * x ** 3)))

    x = wte[idx] + wpe[:T][None]
    for p in params["blocks"]:
        h = ln(x, p["ln1_g"], p["ln1_b"])
        qkv = mm(h, p["attn_w"]) + p["attn_b"]
        q, k, v = jnp.split(qkv, 3, axis=-1)
        q = q.reshape(B, T, n_head, Dh).transpose(0, 2, 1, 3)
        k = k.reshape(B, T, n_head, Dh).transpose(0, 2, 1, 3)
        v = v.reshape(B, T, n_head, Dh).transpose(0, 2, 1, 3)
        s = jnp.einsum("bhqd,bhkd->bhqk", q.astype(jnp.bfloat16),
                       k.astype(jnp.bfloat16),
                       preferred_element_type=jnp.float32) / math.sqrt(Dh)
        mask = jnp.tril(jnp.ones((T, T), bool))
        s = jnp.where(mask, s, -jnp.inf)
        a = jax.nn.softmax(s, axis=-1)
        y = jnp.einsum("bhqk,bhkd->bhqd", a.astype(jnp.bfloat16),
                       v.astype(jnp.bfloat16),
                       preferred_element_type=jnp.float32)
        y = y.transpose(0, 2, 1, 3).reshape(B, T, C)
        x = x + (mm(y, p["proj_w"]) + p["proj_b"])
        h = ln(x, p["ln2_g"], p["ln2_b"])
        h = gelu(mm(h, p["fc_w"]) + p["fc_b"])
        x = x + (mm(h, p["cproj_w"]) + p["cproj_b"])
    x = ln(x, params["lnf_g"], params["lnf_b"])
    return mm(x, wte.T)


# ----------------------------------- main -------------------------------------

if __name__ == "__main__":
    # Small config consistent with GPTConfig semantics.
    n_layer, n_head, n_embd = 2, 4, 32
    vocab_size, block_size = 128, 16
    B, T = 2, 8

    key = jax.random.PRNGKey(0)
    kp, ki = jax.random.split(key)
    params = init_params(
        kp,
        n_layer=n_layer,
        n_head=n_head,
        n_embd=n_embd,
        vocab_size=vocab_size,
        block_size=block_size,
    )
    idx = jax.random.randint(ki, (B, T), 0, vocab_size, dtype=jnp.int32)

    fwd = jax.jit(partial(gpt_forward, n_head=n_head))
    logits = jax.block_until_ready(fwd(params, idx))
    assert logits.shape == (B, T, vocab_size)

    ref = jax.block_until_ready(ref_forward(params, idx, n_head))
    max_err = float(jnp.max(jnp.abs(logits - ref)))
    assert jnp.allclose(logits, ref, atol=5e-3, rtol=5e-3), max_err

    print("KERNEL_OK")
</pallas_src>

<mosaic_0001>
module attributes {stable_mosaic.version = 11 : i64} {
  func.func @kernel(%arg0: i32, %arg1: i32, %arg2: memref<16x32xf32, #tpu.memory_space<vmem>>, %arg3: memref<1x32xf32, #tpu.memory_space<vmem>>, %arg4: memref<1x32xf32, #tpu.memory_space<vmem>>, %arg5: memref<32x96xf32, #tpu.memory_space<vmem>>, %arg6: memref<1x96xf32, #tpu.memory_space<vmem>>, %arg7: memref<16x96xf32, #tpu.memory_space<vmem>>) attributes {dimension_semantics = [#tpu.dimension_semantics<parallel>, #tpu.dimension_semantics<parallel>], iteration_bounds = array<i64: 1, 1>, scalar_prefetch = 0 : i64, scratch_operands = 0 : i64, tpu.core_type = #tpu.core_type<tc>, window_params = [{transform_indices = @transform_0, window_bounds = array<i64: 16, 32>}, {pipeline_mode = #tpu.pipeline_mode<synchronous>, transform_indices = @transform_1, window_bounds = array<i64: 1, 32>}, {pipeline_mode = #tpu.pipeline_mode<synchronous>, transform_indices = @transform_2, window_bounds = array<i64: 1, 32>}, {transform_indices = @transform_3, window_bounds = array<i64: 32, 96>}, {transform_indices = @transform_4, window_bounds = array<i64: 1, 96>}, {transform_indices = @transform_5, window_bounds = array<i64: 16, 96>}]} {
    %c0 = arith.constant 0 : index
    %c0_0 = arith.constant 0 : index
    %0 = vector.load %arg2[%c0, %c0_0] : memref<16x32xf32, #tpu.memory_space<vmem>>, vector<16x32xf32>
    %cst = arith.constant dense<0.000000e+00> : vector<16xf32>
    %1 = vector.multi_reduction <add>, %0, %cst [1] : vector<16x32xf32> to vector<16xf32>
    %2 = vector.shape_cast %1 : vector<16xf32> to vector<16x1xf32>
    %cst_1 = arith.constant 3.200000e+01 : f32
    %3 = vector.broadcast %cst_1 : f32 to vector<16x1xf32>
    %4 = arith.divf %2, %3 : vector<16x1xf32>
    %5 = vector.broadcast %4 : vector<16x1xf32> to vector<16x32xf32>
    %6 = arith.subf %0, %5 : vector<16x32xf32>
    %7 = arith.mulf %6, %6 : vector<16x32xf32>
    %cst_2 = arith.constant dense<0.000000e+00> : vector<16xf32>
    %8 = vector.multi_reduction <add>, %7, %cst_2 [1] : vector<16x32xf32> to vector<16xf32>
    %9 = vector.shape_cast %8 : vector<16xf32> to vector<16x1xf32>
    %cst_3 = arith.constant 3.200000e+01 : f32
    %10 = vector.broadcast %cst_3 : f32 to vector<16x1xf32>
    %11 = arith.divf %9, %10 : vector<16x1xf32>
    %12 = vector.broadcast %4 : vector<16x1xf32> to vector<16x32xf32>
    %13 = arith.subf %0, %12 : vector<16x32xf32>
    %cst_4 = arith.constant 9.99999974E-6 : f32
    %14 = vector.broadcast %cst_4 : f32 to vector<16x1xf32>
    %15 = arith.addf %11, %14 : vector<16x1xf32>
    %16 = math.rsqrt %15 : vector<16x1xf32>
    %17 = vector.broadcast %16 : vector<16x1xf32> to vector<16x32xf32>
    %18 = arith.mulf %13, %17 : vector<16x32xf32>
    %c0_5 = arith.constant 0 : index
    %c0_6 = arith.constant 0 : index
    %19 = vector.load %arg3[%c0_5, %c0_6] : memref<1x32xf32, #tpu.memory_space<vmem>>, vector<1x32xf32>
    %20 = vector.broadcast %19 : vector<1x32xf32> to vector<16x32xf32>
    %21 = arith.mulf %18, %20 : vector<16x32xf32>
    %c0_7 = arith.constant 0 : index
    %c0_8 = arith.constant 0 : index
    %22 = vector.load %arg4[%c0_7, %c0_8] : memref<1x32xf32, #tpu.memory_space<vmem>>, vector<1x32xf32>
    %23 = vector.broadcast %22 : vector<1x32xf32> to vector<16x32xf32>
    %24 = arith.addf %21, %23 : vector<16x32xf32>
    %25 = arith.truncf %24 : vector<16x32xf32> to vector<16x32xbf16>
    %c0_9 = arith.constant 0 : index
    %c0_10 = arith.constant 0 : index
    %26 = vector.load %arg5[%c0_9, %c0_10] : memref<32x96xf32, #tpu.memory_space<vmem>>, vector<32x96xf32>
    %27 = arith.truncf %26 : vector<32x96xf32> to vector<32x96xbf16>
    %cst_11 = arith.constant dense<0.000000e+00> : vector<16x96xf32>
    %28 = tpu.matmul %25, %27, %cst_11 {dimension_numbers = #tpu.dot_dimension_numbers<[1], [0], [0], [1], [0, 0, 1, 1], [], []>} : vector<16x32xbf16>, vector<32x96xbf16>, vector<16x96xf32> -> vector<16x96xf32>
    %c0_12 = arith.constant 0 : index
    %c0_13 = arith.constant 0 : index
    %29 = vector.load %arg6[%c0_12, %c0_13] : memref<1x96xf32, #tpu.memory_space<vmem>>, vector<1x96xf32>
    %30 = vector.broadcast %29 : vector<1x96xf32> to vector<16x96xf32>
    %31 = arith.addf %28, %30 : vector<16x96xf32>
    %c0_14 = arith.constant 0 : index
    %c0_15 = arith.constant 0 : index
    %32 = vector.load %arg7[%c0_14, %c0_15] : memref<16x96xf32, #tpu.memory_space<vmem>>, vector<16x96xf32>
    tpu.vector_store %arg7[%c0_14, %c0_15], %31 {strides = array<i32>} : memref<16x96xf32, #tpu.memory_space<vmem>>, vector<16x96xf32>,
    return
  }
  func.func @transform_0(%arg0: i32, %arg1: i32) -> (i32, i32) {
    %c0_i32 = arith.constant 0 : i32
    %c0_i32_0 = arith.constant 0 : i32
    return %arg0, %c0_i32 : i32, i32
  }
  func.func @transform_1(%arg0: i32, %arg1: i32) -> (i32, i32) {
    %c0_i32 = arith.constant 0 : i32
    %c0_i32_0 = arith.constant 0 : i32
    %c0_i32_1 = arith.constant 0 : i32
    return %c0_i32, %c0_i32_0 : i32, i32
  }
  func.func @transform_2(%arg0: i32, %arg1: i32) -> (i32, i32) {
    %c0_i32 = arith.constant 0 : i32
    %c0_i32_0 = arith.constant 0 : i32
    %c0_i32_1 = arith.constant 0 : i32
    return %c0_i32, %c0_i32_0 : i32, i32
  }
  func.func @transform_3(%arg0: i32, %arg1: i32) -> (i32, i32) {
    %c0_i32 = arith.constant 0 : i32
    %c0_i32_0 = arith.constant 0 : i32
    return %c0_i32, %arg1 : i32, i32
  }
  func.func @transform_4(%arg0: i32, %arg1: i32) -> (i32, i32) {
    %c0_i32 = arith.constant 0 : i32
    %c0_i32_0 = arith.constant 0 : i32
    return %c0_i32, %arg1 : i32, i32
  }
  func.func @transform_5(%arg0: i32, %arg1: i32) -> (i32, i32) {
    %c0_i32 = arith.constant 0 : i32
    return %arg0, %arg1 : i32, i32
  }
}

module attributes {stable_mosaic.version = 11 : i64} {
  func.func @kernel(%arg0: i32, %arg1: i32, %arg2: memref<16x32xf32, #tpu.memory_space<vmem>>, %arg3: memref<1x32xf32, #tpu.memory_space<vmem>>, %arg4: memref<1x32xf32, #tpu.memory_space<vmem>>, %arg5: memref<32x128xf32, #tpu.memory_space<vmem>>, %arg6: memref<1x128xf32, #tpu.memory_space<vmem>>, %arg7: memref<16x128xf32, #tpu.memory_space<vmem>>) attributes {dimension_semantics = [#tpu.dimension_semantics<parallel>, #tpu.dimension_semantics<parallel>], iteration_bounds = array<i64: 1, 1>, scalar_prefetch = 0 : i64, scratch_operands = 0 : i64, tpu.core_type = #tpu.core_type<tc>, window_params = [{transform_indices = @transform_0, window_bounds = array<i64: 16, 32>}, {pipeline_mode = #tpu.pipeline_mode<synchronous>, transform_indices = @transform_1, window_bounds = array<i64: 1, 32>}, {pipeline_mode = #tpu.pipeline_mode<synchronous>, transform_indices = @transform_2, window_bounds = array<i64: 1, 32>}, {transform_indices = @transform_3, window_bounds = array<i64: 32, 128>}, {transform_indices = @transform_4, window_bounds = array<i64: 1, 128>}, {transform_indices = @transform_5, window_bounds = array<i64: 16, 128>}]} {
    %c0 = arith.constant 0 : index
    %c0_0 = arith.constant 0 : index
    %0 = vector.load %arg2[%c0, %c0_0] : memref<16x32xf32, #tpu.memory_space<vmem>>, vector<16x32xf32>
    %cst = arith.constant dense<0.000000e+00> : vector<16xf32>
    %1 = vector.multi_reduction <add>, %0, %cst [1] : vector<16x32xf32> to vector<16xf32>
    %2 = vector.shape_cast %1 : vector<16xf32> to vector<16x1xf32>
    %cst_1 = arith.constant 3.200000e+01 : f32
    %3 = vector.broadcast %cst_1 : f32 to vector<16x1xf32>
    %4 = arith.divf %2, %3 : vector<16x1xf32>
    %5 = vector.broadcast %4 : vector<16x1xf32> to vector<16x32xf32>
    %6 = arith.subf %0, %5 : vector<16x32xf32>
    %7 = arith.mulf %6, %6 : vector<16x32xf32>
    %cst_2 = arith.constant dense<0.000000e+00> : vector<16xf32>
    %8 = vector.multi_reduction <add>, %7, %cst_2 [1] : vector<16x32xf32> to vector<16xf32>
    %9 = vector.shape_cast %8 : vector<16xf32> to vector<16x1xf32>
    %cst_3 = arith.constant 3.200000e+01 : f32
    %10 = vector.broadcast %cst_3 : f32 to vector<16x1xf32>
    %11 = arith.divf %9, %10 : vector<16x1xf32>
    %12 = vector.broadcast %4 : vector<16x1xf32> to vector<16x32xf32>
    %13 = arith.subf %0, %12 : vector<16x32xf32>
    %cst_4 = arith.constant 9.99999974E-6 : f32
    %14 = vector.broadcast %cst_4 : f32 to vector<16x1xf32>
    %15 = arith.addf %11, %14 : vector<16x1xf32>
    %16 = math.rsqrt %15 : vector<16x1xf32>
    %17 = vector.broadcast %16 : vector<16x1xf32> to vector<16x32xf32>
    %18 = arith.mulf %13, %17 : vector<16x32xf32>
    %c0_5 = arith.constant 0 : index
    %c0_6 = arith.constant 0 : index
    %19 = vector.load %arg3[%c0_5, %c0_6] : memref<1x32xf32, #tpu.memory_space<vmem>>, vector<1x32xf32>
    %20 = vector.broadcast %19 : vector<1x32xf32> to vector<16x32xf32>
    %21 = arith.mulf %18, %20 : vector<16x32xf32>
    %c0_7 = arith.constant 0 : index
    %c0_8 = arith.constant 0 : index
    %22 = vector.load %arg4[%c0_7, %c0_8] : memref<1x32xf32, #tpu.memory_space<vmem>>, vector<1x32xf32>
    %23 = vector.broadcast %22 : vector<1x32xf32> to vector<16x32xf32>
    %24 = arith.addf %21, %23 : vector<16x32xf32>
    %25 = arith.truncf %24 : vector<16x32xf32> to vector<16x32xbf16>
    %c0_9 = arith.constant 0 : index
    %c0_10 = arith.constant 0 : index
    %26 = vector.load %arg5[%c0_9, %c0_10] : memref<32x128xf32, #tpu.memory_space<vmem>>, vector<32x128xf32>
    %27 = arith.truncf %26 : vector<32x128xf32> to vector<32x128xbf16>
    %cst_11 = arith.constant dense<0.000000e+00> : vector<16x128xf32>
    %28 = tpu.matmul %25, %27, %cst_11 {dimension_numbers = #tpu.dot_dimension_numbers<[1], [0], [0], [1], [0, 0, 1, 1], [], []>} : vector<16x32xbf16>, vector<32x128xbf16>, vector<16x128xf32> -> vector<16x128xf32>
    %c0_12 = arith.constant 0 : index
    %c0_13 = arith.constant 0 : index
    %29 = vector.load %arg6[%c0_12, %c0_13] : memref<1x128xf32, #tpu.memory_space<vmem>>, vector<1x128xf32>
    %30 = vector.broadcast %29 : vector<1x128xf32> to vector<16x128xf32>
    %31 = arith.addf %28, %30 : vector<16x128xf32>
    %cst_14 = arith.constant 5.000000e-01 : f32
    %32 = vector.broadcast %cst_14 : f32 to vector<16x128xf32>
    %33 = arith.mulf %32, %31 : vector<16x128xf32>
    %cst_15 = arith.constant 4.471500e-02 : f32
    %34 = vector.broadcast %cst_15 : f32 to vector<16x128xf32>
    %35 = arith.mulf %34, %31 : vector<16x128xf32>
    %36 = arith.mulf %35, %31 : vector<16x128xf32>
    %37 = arith.mulf %36, %31 : vector<16x128xf32>
    %38 = arith.addf %31, %37 : vector<16x128xf32>
    %cst_16 = arith.constant 0.797884583 : f32
    %39 = vector.broadcast %cst_16 : f32 to vector<16x128xf32>
    %40 = arith.mulf %39, %38 : vector<16x128xf32>
    %41 = math.tanh %40 : vector<16x128xf32>
    %cst_17 = arith.constant 1.000000e+00 : f32
    %42 = vector.broadcast %cst_17 : f32 to vector<16x128xf32>
    %43 = arith.addf %42, %41 : vector<16x128xf32>
    %44 = arith.mulf %33, %43 : vector<16x128xf32>
    %c0_18 = arith.constant 0 : index
    %c0_19 = arith.constant 0 : index
    %45 = vector.load %arg7[%c0_18, %c0_19] : memref<16x128xf32, #tpu.memory_space<vmem>>, vector<16x128xf32>
    tpu.vector_store %arg7[%c0_18, %c0_19], %44 {strides = array<i32>} : memref<16x128xf32, #tpu.memory_space<vmem>>, vector<16x128xf32>,
    return
  }
  func.func @transform_0(%arg0: i32, %arg1: i32) -> (i32, i32) {
    %c0_i32 = arith.constant 0 : i32
    %c0_i32_0 = arith.constant 0 : i32
    return %arg0, %c0_i32 : i32, i32
  }
  func.func @transform_1(%arg0: i32, %arg1: i32) -> (i32, i32) {
    %c0_i32 = arith.constant 0 : i32
    %c0_i32_0 = arith.constant 0 : i32
    %c0_i32_1 = arith.constant 0 : i32
    return %c0_i32, %c0_i32_0 : i32, i32
  }
  func.func @transform_2(%arg0: i32, %arg1: i32) -> (i32, i32) {
    %c0_i32 = arith.constant 0 : i32
    %c0_i32_0 = arith.constant 0 : i32
    %c0_i32_1 = arith.constant 0 : i32
    return %c0_i32, %c0_i32_0 : i32, i32
  }
  func.func @transform_3(%arg0: i32, %arg1: i32) -> (i32, i32) {
    %c0_i32 = arith.constant 0 : i32
    %c0_i32_0 = arith.constant 0 : i32
    return %c0_i32, %arg1 : i32, i32
  }
  func.func @transform_4(%arg0: i32, %arg1: i32) -> (i32, i32) {
    %c0_i32 = arith.constant 0 : i32
    %c0_i32_0 = arith.constant 0 : i32
    return %c0_i32, %arg1 : i32, i32
  }
  func.func @transform_5(%arg0: i32, %arg1: i32) -> (i32, i32) {
    %c0_i32 = arith.constant 0 : i32
    return %arg0, %arg1 : i32, i32
  }
}

module attributes {stable_mosaic.version = 11 : i64} {
  func.func @_linear_kernel(%arg0: i32, %arg1: i32, %arg2: i32, %arg3: memref<16x32xf32, #tpu.memory_space<vmem>>, %arg4: memref<32x32xf32, #tpu.memory_space<vmem>>, %arg5: memref<1x32xf32, #tpu.memory_space<vmem>>, %arg6: memref<16x32xf32, #tpu.memory_space<vmem>>, %arg7: memref<16x32xf32, #tpu.memory_space<vmem>>) attributes {dimension_semantics = [#tpu.dimension_semantics<parallel>, #tpu.dimension_semantics<parallel>, #tpu.dimension_semantics<arbitrary>], iteration_bounds = array<i64: 1, 1, 1>, scalar_prefetch = 0 : i64, scratch_operands = 1 : i64, tpu.core_type = #tpu.core_type<tc>, window_params = [{transform_indices = @transform_0, window_bounds = array<i64: 16, 32>}, {transform_indices = @transform_1, window_bounds = array<i64: 32, 32>}, {transform_indices = @transform_2, window_bounds = array<i64: 1, 32>}, {transform_indices = @transform_3, window_bounds = array<i64: 16, 32>}]} {
    %c0_i32 = arith.constant 0 : i32
    %0 = arith.cmpi eq, %arg2, %c0_i32 : i32
    %1 = arith.extui %0 : i1 to i32
    %c0_i32_0 = arith.constant 0 : i32
    %2 = arith.cmpi ne, %1, %c0_i32_0 : i32
    scf.if %2 {
      %cst_10 = arith.constant 0.000000e+00 : f32
      %14 = vector.broadcast %cst_10 : f32 to vector<16x32xf32>
      %c0_11 = arith.constant 0 : index
      %c0_12 = arith.constant 0 : index
      %15 = vector.load %arg7[%c0_11, %c0_12] : memref<16x32xf32, #tpu.memory_space<vmem>>, vector<16x32xf32>
      tpu.vector_store %arg7[%c0_11, %c0_12], %14 {strides = array<i32>} : memref<16x32xf32, #tpu.memory_space<vmem>>, vector<16x32xf32>,
    } else {
    }
    %c0 = arith.constant 0 : index
    %c0_1 = arith.constant 0 : index
    %3 = vector.load %arg7[%c0, %c0_1] : memref<16x32xf32, #tpu.memory_space<vmem>>, vector<16x32xf32>
    %c0_2 = arith.constant 0 : index
    %c0_3 = arith.constant 0 : index
    %4 = vector.load %arg3[%c0_2, %c0_3] : memref<16x32xf32, #tpu.memory_space<vmem>>, vector<16x32xf32>
    %5 = arith.truncf %4 : vector<16x32xf32> to vector<16x32xbf16>
    %c0_4 = arith.constant 0 : index
    %c0_5 = arith.constant 0 : index
    %6 = vector.load %arg4[%c0_4, %c0_5] : memref<32x32xf32, #tpu.memory_space<vmem>>, vector<32x32xf32>
    %7 = arith.truncf %6 : vector<32x32xf32> to vector<32x32xbf16>
    %cst = arith.constant dense<0.000000e+00> : vector<16x32xf32>
    %8 = tpu.matmul %5, %7, %cst {dimension_numbers = #tpu.dot_dimension_numbers<[1], [0], [0], [1], [0, 0, 1, 1], [], []>} : vector<16x32xbf16>, vector<32x32xbf16>, vector<16x32xf32> -> vector<16x32xf32>
    %9 = arith.addf %3, %8 : vector<16x32xf32>
    %c0_6 = arith.constant 0 : index
    %c0_7 = arith.constant 0 : index
    %10 = vector.load %arg7[%c0_6, %c0_7] : memref<16x32xf32, #tpu.memory_space<vmem>>, vector<16x32xf32>
    tpu.vector_store %arg7[%c0_6, %c0_7], %9 {strides = array<i32>} : memref<16x32xf32, #tpu.memory_space<vmem>>, vector<16x32xf32>,
    %c0_i32_8 = arith.constant 0 : i32
    %11 = arith.cmpi eq, %arg2, %c0_i32_8 : i32
    %12 = arith.extui %11 : i1 to i32
    %c0_i32_9 = arith.constant 0 : i32
    %13 = arith.cmpi ne, %12, %c0_i32_9 : i32
    scf.if %13 {
      %c0_10 = arith.constant 0 : index
      %c0_11 = arith.constant 0 : index
      %14 = vector.load %arg7[%c0_10, %c0_11] : memref<16x32xf32, #tpu.memory_space<vmem>>, vector<16x32xf32>
      %c0_12 = arith.constant 0 : index
      %c0_13 = arith.constant 0 : index
      %15 = vector.load %arg5[%c0_12, %c0_13] : memref<1x32xf32, #tpu.memory_space<vmem>>, vector<1x32xf32>
      %16 = vector.broadcast %15 : vector<1x32xf32> to vector<16x32xf32>
      %17 = arith.addf %14, %16 : vector<16x32xf32>
      %c0_14 = arith.constant 0 : index
      %c0_15 = arith.constant 0 : index
      %18 = vector.load %arg6[%c0_14, %c0_15] : memref<16x32xf32, #tpu.memory_space<vmem>>, vector<16x32xf32>
      tpu.vector_store %arg6[%c0_14, %c0_15], %17 {strides = array<i32>} : memref<16x32xf32, #tpu.memory_space<vmem>>, vector<16x32xf32>,
    } else {
    }
    return
  }
  func.func @transform_0(%arg0: i32, %arg1: i32, %arg2: i32) -> (i32, i32) {
    %c0_i32 = arith.constant 0 : i32
    return %arg0, %arg2 : i32, i32
  }
  func.func @transform_1(%arg0: i32, %arg1: i32, %arg2: i32) -> (i32, i32) {
    %c0_i32 = arith.constant 0 : i32
    return %arg2, %arg1 : i32, i32
  }
  func.func @transform_2(%arg0: i32, %arg1: i32, %arg2: i32) -> (i32, i32) {
    %c0_i32 = arith.constant 0 : i32
    %c0_i32_0 = arith.constant 0 : i32
    return %c0_i32, %arg1 : i32, i32
  }
  func.func @transform_3(%arg0: i32, %arg1: i32, %arg2: i32) -> (i32, i32) {
    %c0_i32 = arith.constant 0 : i32
    return %arg0, %arg1 : i32, i32
  }
}

module attributes {stable_mosaic.version = 11 : i64} {
  func.func @_attn_kernel(%arg0: i32, %arg1: i32, %arg2: i32, %arg3: memref<1x8x32xf32, #tpu.memory_space<vmem>>, %arg4: memref<1x8x32xf32, #tpu.memory_space<vmem>>, %arg5: memref<1x8x32xf32, #tpu.memory_space<vmem>>, %arg6: memref<1x8x32xf32, #tpu.memory_space<vmem>>, %arg7: memref<4x8x1xf32, #tpu.memory_space<vmem>>, %arg8: memref<4x8x1xf32, #tpu.memory_space<vmem>>, %arg9: memref<4x8x8xf32, #tpu.memory_space<vmem>>) attributes {dimension_semantics = [#tpu.dimension_semantics<parallel>, #tpu.dimension_semantics<parallel>, #tpu.dimension_semantics<arbitrary>], iteration_bounds = array<i64: 2, 1, 1>, scalar_prefetch = 0 : i64, scratch_operands = 3 : i64, tpu.core_type = #tpu.core_type<tc>, window_params = [{transform_indices = @transform_0, window_bounds = array<i64: 1, 8, 32>}, {transform_indices = @transform_1, window_bounds = array<i64: 1, 8, 32>}, {transform_indices = @transform_2, window_bounds = array<i64: 1, 8, 32>}, {transform_indices = @transform_3, window_bounds = array<i64: 1, 8, 32>}]} {
    %c0_i32 = arith.constant 0 : i32
    %0 = arith.cmpi eq, %arg2, %c0_i32 : i32
    %1 = arith.extui %0 : i1 to i32
    %c0_i32_0 = arith.constant 0 : i32
    %2 = arith.cmpi ne, %1, %c0_i32_0 : i32
    scf.if %2 {
      %cst = arith.constant -1.000000e+30 : f32
      %12 = vector.broadcast %cst : f32 to vector<4x8x1xf32>
      %c0 = arith.constant 0 : index
      %c0_5 = arith.constant 0 : index
      %c0_6 = arith.constant 0 : index
      %13 = vector.load %arg7[%c0, %c0_5, %c0_6] : memref<4x8x1xf32, #tpu.memory_space<vmem>>, vector<4x8x1xf32>
      tpu.vector_store %arg7[%c0, %c0_5, %c0_6], %12 {strides = array<i32>} : memref<4x8x1xf32, #tpu.memory_space<vmem>>, vector<4x8x1xf32>,
      %cst_7 = arith.constant 0.000000e+00 : f32
      %14 = vector.broadcast %cst_7 : f32 to vector<4x8x1xf32>
      %c0_8 = arith.constant 0 : index
      %c0_9 = arith.constant 0 : index
      %c0_10 = arith.constant 0 : index
      %15 = vector.load %arg8[%c0_8, %c0_9, %c0_10] : memref<4x8x1xf32, #tpu.memory_space<vmem>>, vector<4x8x1xf32>
      tpu.vector_store %arg8[%c0_8, %c0_9, %c0_10], %14 {strides = array<i32>} : memref<4x8x1xf32, #tpu.memory_space<vmem>>, vector<4x8x1xf32>,
      %cst_11 = arith.constant 0.000000e+00 : f32
      %16 = vector.broadcast %cst_11 : f32 to vector<4x8x8xf32>
      %c0_12 = arith.constant 0 : index
      %c0_13 = arith.constant 0 : index
      %c0_14 = arith.constant 0 : index
      %17 = vector.load %arg9[%c0_12, %c0_13, %c0_14] : memref<4x8x8xf32, #tpu.memory_space<vmem>>, vector<4x8x8xf32>
      tpu.vector_store %arg9[%c0_12, %c0_13, %c0_14], %16 {strides = array<i32>} : memref<4x8x8xf32, #tpu.memory_space<vmem>>, vector<4x8x8xf32>,
    } else {
    }
    %c8_i32 = arith.constant 8 : i32
    %3 = arith.muli %arg1, %c8_i32 : i32
    %c8_i32_1 = arith.constant 8 : i32
    %4 = arith.muli %arg2, %c8_i32_1 : i32
    %c7_i32 = arith.constant 7 : i32
    %5 = arith.addi %3, %c7_i32 : i32
    %6 = arith.cmpi sle, %4, %5 : i32
    %7 = arith.extui %6 : i1 to i32
    %c0_i32_2 = arith.constant 0 : i32
    %8 = arith.cmpi ne, %7, %c0_i32_2 : i32
    scf.if %8 {
      %12 = tpu.iota {dimensions = array<i32: 0>} : vector<8x8xi32>
      %13 = vector.broadcast %3 : i32 to vector<8x8xi32>
      %14 = arith.addi %13, %12 : vector<8x8xi32>
      %15 = tpu.iota {dimensions = array<i32: 1>} : vector<8x8xi32>
      %16 = vector.broadcast %4 : i32 to vector<8x8xi32>
      %17 = arith.addi %16, %15 : vector<8x8xi32>
      %18 = arith.cmpi sle, %17, %14 : vector<8x8xi32>
      %c0 = arith.constant 0 : index
      %c0_5 = arith.constant 0 : index
      %c0_6 = arith.constant 0 : index
      %19 = vector.load %arg3[%c0, %c0_5, %c0_6] : memref<1x8x32xf32, #tpu.memory_space<vmem>>, vector<1x8x32xf32>
      %20 = vector.shape_cast %19 : vector<1x8x32xf32> to vector<8x32xf32>
      %21 = arith.truncf %20 : vector<8x32xf32> to vector<8x32xbf16>
      %c0_7 = arith.constant 0 : index
      %c0_8 = arith.constant 0 : index
      %c0_9 = arith.constant 0 : index
      %22 = vector.load %arg4[%c0_7, %c0_8, %c0_9] : memref<1x8x32xf32, #tpu.memory_space<vmem>>, vector<1x8x32xf32>
      %23 = vector.shape_cast %22 : vector<1x8x32xf32> to vector<8x32xf32>
      %24 = arith.truncf %23 : vector<8x32xf32> to vector<8x32xbf16>
      %c0_10 = arith.constant 0 : index
      %c0_11 = arith.constant 0 : index
      %c0_12 = arith.constant 0 : index
      %25 = vector.load %arg5[%c0_10, %c0_11, %c0_12] : memref<1x8x32xf32, #tpu.memory_space<vmem>>, vector<1x8x32xf32>
      %26 = vector.shape_cast %25 : vector<1x8x32xf32> to vector<8x32xf32>
      %27 = arith.truncf %26 : vector<8x32xf32> to vector<8x32xbf16>
      %28 = vector.extract_strided_slice %21 {offsets = [0, 0], sizes = [8, 8], strides = [1, 1]} : vector<8x32xbf16> to vector<8x8xbf16>
      %29 = vector.extract_strided_slice %24 {offsets = [0, 0], sizes = [8, 8], strides = [1, 1]} : vector<8x32xbf16> to vector<8x8xbf16>
      %cst = arith.constant dense<0.000000e+00> : vector<8x8xf32>
      %30 = tpu.matmul %28, %29, %cst {dimension_numbers = #tpu.dot_dimension_numbers<[1], [1], [0], [0], [0, 0, 1, 0], [], []>} : vector<8x8xbf16>, vector<8x8xbf16>, vector<8x8xf32> -> vector<8x8xf32>
      %cst_13 = arith.constant 0.353553385 : f32
      %31 = vector.broadcast %cst_13 : f32 to vector<8x8xf32>
      %32 = arith.mulf %30, %31 : vector<8x8xf32>
      %cst_14 = arith.constant -1.000000e+30 : f32
      %33 = vector.broadcast %cst_14 : f32 to vector<8x8xf32>
      %34 = arith.select %18, %32, %33 : vector<8x8xi1>, vector<8x8xf32>
      %c0_15 = arith.constant 0 : index
      %c0_16 = arith.constant 0 : index
      %c0_17 = arith.constant 0 : index
      %35 = vector.load %arg7[%c0_15, %c0_16, %c0_17] : memref<4x8x1xf32, #tpu.memory_space<vmem>>, vector<1x8x1xf32>
      %36 = vector.shape_cast %35 : vector<1x8x1xf32> to vector<8x1xf32>
      %cst_18 = arith.constant dense<0xFF800000> : vector<8xf32>
      %37 = vector.multi_reduction <maximumf>, %34, %cst_18 [1] : vector<8x8xf32> to vector<8xf32>
      %38 = vector.shape_cast %37 : vector<8xf32> to vector<8x1xf32>
      %39 = arith.maximumf %36, %38 : vector<8x1xf32>
      %40 = arith.subf %36, %39 : vector<8x1xf32>
      %41 = math.exp %40 : vector<8x1xf32>
      %42 = vector.broadcast %39 : vector<8x1xf32> to vector<8x8xf32>
      %43 = arith.subf %34, %42 : vector<8x8xf32>
      %44 = math.exp %43 : vector<8x8xf32>
      %c0_19 = arith.constant 0 : index
      %c0_20 = arith.constant 0 : index
      %c0_21 = arith.constant 0 : index
      %45 = vector.load %arg8[%c0_19, %c0_20, %c0_21] : memref<4x8x1xf32, #tpu.memory_space<vmem>>, vector<1x8x1xf32>
      %46 = vector.shape_cast %45 : vector<1x8x1xf32> to vector<8x1xf32>
      %47 = arith.mulf %41, %46 : vector<8x1xf32>
      %cst_22 = arith.constant dense<0.000000e+00> : vector<8xf32>
      %48 = vector.multi_reduction <add>, %44, %cst_22 [1] : vector<8x8xf32> to vector<8xf32>
      %49 = vector.shape_cast %48 : vector<8xf32> to vector<8x1xf32>
      %50 = arith.addf %47, %49 : vector<8x1xf32>
      %c0_23 = arith.constant 0 : index
      %c0_24 = arith.constant 0 : index
      %c0_25 = arith.constant 0 : index
      %51 = vector.load %arg8[%c0_23, %c0_24, %c0_25] : memref<4x8x1xf32, #tpu.memory_space<vmem>>, vector<1x8x1xf32>
      %52 = vector.shape_cast %51 : vector<1x8x1xf32> to vector<8x1xf32>
      %53 = vector.shape_cast %50 : vector<8x1xf32> to vector<1x8x1xf32>
      tpu.vector_store %arg8[%c0_23, %c0_24, %c0_25], %53 {strides = array<i32>} : memref<4x8x1xf32, #tpu.memory_space<vmem>>, vector<1x8x1xf32>,
      %c0_26 = arith.constant 0 : index
      %c0_27 = arith.constant 0 : index
      %c0_28 = arith.constant 0 : index
      %54 = vector.load %arg9[%c0_26, %c0_27, %c0_28] : memref<4x8x8xf32, #tpu.memory_space<vmem>>, vector<1x8x8xf32>
      %55 = vector.shape_cast %54 : vector<1x8x8xf32> to vector<8x8xf32>
      %56 = vector.broadcast %41 : vector<8x1xf32> to vector<8x8xf32>
      %57 = arith.mulf %56, %55 : vector<8x8xf32>
      %58 = arith.truncf %44 : vector<8x8xf32> to vector<8x8xbf16>
      %59 = vector.extract_strided_slice %27 {offsets = [0, 0], sizes = [8, 8], strides = [1, 1]} : vector<8x32xbf16> to vector<8x8xbf16>
      %cst_29 = arith.constant dense<0.000000e+00> : vector<8x8xf32>
      %60 = tpu.matmul %58, %59, %cst_29 {dimension_numbers = #tpu.dot_dimension_numbers<[1], [0], [0], [1], [0, 0, 1, 1], [], []>} : vector<8x8xbf16>, vector<8x8xbf16>, vector<8x8xf32> -> vector<8x8xf32>
      %61 = arith.addf %57, %60 : vector<8x8xf32>
      %c0_30 = arith.constant 0 : index
      %c0_31 = arith.constant 0 : index
      %c0_32 = arith.constant 0 : index
      %62 = vector.load %arg9[%c0_30, %c0_31, %c0_32] : memref<4x8x8xf32, #tpu.memory_space<vmem>>, vector<1x8x8xf32>
      %63 = vector.shape_cast %62 : vector<1x8x8xf32> to vector<8x8xf32>
      %64 = vector.shape_cast %61 : vector<8x8xf32> to vector<1x8x8xf32>
      tpu.vector_store %arg9[%c0_30, %c0_31, %c0_32], %64 {strides = array<i32>} : memref<4x8x8xf32, #tpu.memory_space<vmem>>, vector<1x8x8xf32>,
      %c0_33 = arith.constant 0 : index
      %c0_34 = arith.constant 0 : index
      %c0_35 = arith.constant 0 : index
      %65 = vector.load %arg7[%c0_33, %c0_34, %c0_35] : memref<4x8x1xf32, #tpu.memory_space<vmem>>, vector<1x8x1xf32>
      %66 = vector.shape_cast %65 : vector<1x8x1xf32> to vector<8x1xf32>
      %67 = vector.shape_cast %39 : vector<8x1xf32> to vector<1x8x1xf32>
      tpu.vector_store %arg7[%c0_33, %c0_34, %c0_35], %67 {strides = array<i32>} : memref<4x8x1xf32, #tpu.memory_space<vmem>>, vector<1x8x1xf32>,
      %68 = vector.extract_strided_slice %21 {offsets = [0, 8], sizes = [8, 8], strides = [1, 1]} : vector<8x32xbf16> to vector<8x8xbf16>
      %69 = vector.extract_strided_slice %24 {offsets = [0, 8], sizes = [8, 8], strides = [1, 1]} : vector<8x32xbf16> to vector<8x8xbf16>
      %cst_36 = arith.constant dense<0.000000e+00> : vector<8x8xf32>
      %70 = tpu.matmul %68, %69, %cst_36 {dimension_numbers = #tpu.dot_dimension_numbers<[1], [1], [0], [0], [0, 0, 1, 0], [], []>} : vector<8x8xbf16>, vector<8x8xbf16>, vector<8x8xf32> -> vector<8x8xf32>
      %cst_37 = arith.constant 0.353553385 : f32
      %71 = vector.broadcast %cst_37 : f32 to vector<8x8xf32>
      %72 = arith.mulf %70, %71 : vector<8x8xf32>
      %cst_38 = arith.constant -1.000000e+30 : f32
      %73 = vector.broadcast %cst_38 : f32 to vector<8x8xf32>
      %74 = arith.select %18, %72, %73 : vector<8x8xi1>, vector<8x8xf32>
      %c1 = arith.constant 1 : index
      %c0_39 = arith.constant 0 : index
      %c0_40 = arith.constant 0 : index
      %75 = vector.load %arg7[%c1, %c0_39, %c0_40] : memref<4x8x1xf32, #tpu.memory_space<vmem>>, vector<1x8x1xf32>
      %76 = vector.shape_cast %75 : vector<1x8x1xf32> to vector<8x1xf32>
      %cst_41 = arith.constant dense<0xFF800000> : vector<8xf32>
      %77 = vector.multi_reduction <maximumf>, %74, %cst_41 [1] : vector<8x8xf32> to vector<8xf32>
      %78 = vector.shape_cast %77 : vector<8xf32> to vector<8x1xf32>
      %79 = arith.maximumf %76, %78 : vector<8x1xf32>
      %80 = arith.subf %76, %79 : vector<8x1xf32>
      %81 = math.exp %80 : vector<8x1xf32>
      %82 = vector.broadcast %79 : vector<8x1xf32> to vector<8x8xf32>
      %83 = arith.subf %74, %82 : vector<8x8xf32>
      %84 = math.exp %83 : vector<8x8xf32>
      %c1_42 = arith.constant 1 : index
      %c0_43 = arith.constant 0 : index
      %c0_44 = arith.constant 0 : index
      %85 = vector.load %arg8[%c1_42, %c0_43, %c0_44] : memref<4x8x1xf32, #tpu.memory_space<vmem>>, vector<1x8x1xf32>
      %86 = vector.shape_cast %85 : vector<1x8x1xf32> to vector<8x1xf32>
      %87 = arith.mulf %81, %86 : vector<8x1xf32>
      %cst_45 = arith.constant dense<0.000000e+00> : vector<8xf32>
      %88 = vector.multi_reduction <add>, %84, %cst_45 [1] : vector<8x8xf32> to vector<8xf32>
      %89 = vector.shape_cast %88 : vector<8xf32> to vector<8x1xf32>
      %90 = arith.addf %87, %89 : vector<8x1xf32>
      %c1_46 = arith.constant 1 : index
      %c0_47 = arith.constant 0 : index
      %c0_48 = arith.constant 0 : index
      %91 = vector.load %arg8[%c1_46, %c0_47, %c0_48] : memref<4x8x1xf32, #tpu.memory_space<vmem>>, vector<1x8x1xf32>
      %92 = vector.shape_cast %91 : vector<1x8x1xf32> to vector<8x1xf32>
      %93 = vector.shape_cast %90 : vector<8x1xf32> to vector<1x8x1xf32>
      tpu.vector_store %arg8[%c1_46, %c0_47, %c0_48], %93 {strides = array<i32>} : memref<4x8x1xf32, #tpu.memory_space<vmem>>, vector<1x8x1xf32>,
      %c1_49 = arith.constant 1 : index
      %c0_50 = arith.constant 0 : index
      %c0_51 = arith.constant 0 : index
      %94 = vector.load %arg9[%c1_49, %c0_50, %c0_51] : memref<4x8x8xf32, #tpu.memory_space<vmem>>, vector<1x8x8xf32>
      %95 = vector.shape_cast %94 : vector<1x8x8xf32> to vector<8x8xf32>
      %96 = vector.broadcast %81 : vector<8x1xf32> to vector<8x8xf32>
      %97 = arith.mulf %96, %95 : vector<8x8xf32>
      %98 = arith.truncf %84 : vector<8x8xf32> to vector<8x8xbf16>
      %99 = vector.extract_strided_slice %27 {offsets = [0, 8], sizes = [8, 8], strides = [1, 1]} : vector<8x32xbf16> to vector<8x8xbf16>
      %cst_52 = arith.constant dense<0.000000e+00> : vector<8x8xf32>
      %100 = tpu.matmul %98, %99, %cst_52 {dimension_numbers = #tpu.dot_dimension_numbers<[1], [0], [0], [1], [0, 0, 1, 1], [], []>} : vector<8x8xbf16>, vector<8x8xbf16>, vector<8x8xf32> -> vector<8x8xf32>
      %101 = arith.addf %97, %100 : vector<8x8xf32>
      %c1_53 = arith.constant 1 : index
      %c0_54 = arith.constant 0 : index
      %c0_55 = arith.constant 0 : index
      %102 = vector.load %arg9[%c1_53, %c0_54, %c0_55] : memref<4x8x8xf32, #tpu.memory_space<vmem>>, vector<1x8x8xf32>
      %103 = vector.shape_cast %102 : vector<1x8x8xf32> to vector<8x8xf32>
      %104 = vector.shape_cast %101 : vector<8x8xf32> to vector<1x8x8xf32>
      tpu.vector_store %arg9[%c1_53, %c0_54, %c0_55], %104 {strides = array<i32>} : memref<4x8x8xf32, #tpu.memory_space<vmem>>, vector<1x8x8xf32>,
      %c1_56 = arith.constant 1 : index
      %c0_57 = arith.constant 0 : index
      %c0_58 = arith.constant 0 : index
      %105 = vector.load %arg7[%c1_56, %c0_57, %c0_58] : memref<4x8x1xf32, #tpu.memory_space<vmem>>, vector<1x8x1xf32>
      %106 = vector.shape_cast %105 : vector<1x8x1xf32> to vector<8x1xf32>
      %107 = vector.shape_cast %79 : vector<8x1xf32> to vector<1x8x1xf32>
      tpu.vector_store %arg7[%c1_56, %c0_57, %c0_58], %107 {strides = array<i32>} : memref<4x8x1xf32, #tpu.memory_space<vmem>>, vector<1x8x1xf32>,
      %108 = vector.extract_strided_slice %21 {offsets = [0, 16], sizes = [8, 8], strides = [1, 1]} : vector<8x32xbf16> to vector<8x8xbf16>
      %109 = vector.extract_strided_slice %24 {offsets = [0, 16], sizes = [8, 8], strides = [1, 1]} : vector<8x32xbf16> to vector<8x8xbf16>
      %cst_59 = arith.constant dense<0.000000e+00> : vector<8x8xf32>
      %110 = tpu.matmul %108, %109, %cst_59 {dimension_numbers = #tpu.dot_dimension_numbers<[1], [1], [0], [0], [0, 0, 1, 0], [], []>} : vector<8x8xbf16>, vector<8x8xbf16>, vector<8x8xf32> -> vector<8x8xf32>
      %cst_60 = arith.constant 0.353553385 : f32
      %111 = vector.broadcast %cst_60 : f32 to vector<8x8xf32>
      %112 = arith.mulf %110, %111 : vector<8x8xf32>
      %cst_61 = arith.constant -1.000000e+30 : f32
      %113 = vector.broadcast %cst_61 : f32 to vector<8x8xf32>
      %114 = arith.select %18, %112, %113 : vector<8x8xi1>, vector<8x8xf32>
      %c2 = arith.constant 2 : index
      %c0_62 = arith.constant 0 : index
      %c0_63 = arith.constant 0 : index
      %115 = vector.load %arg7[%c2, %c0_62, %c0_63] : memref<4x8x1xf32, #tpu.memory_space<vmem>>, vector<1x8x1xf32>
      %116 = vector.shape_cast %115 : vector<1x8x1xf32> to vector<8x1xf32>
      %cst_64 = arith.constant dense<0xFF800000> : vector<8xf32>
      %117 = vector.multi_reduction <maximumf>, %114, %cst_64 [1] : vector<8x8xf32> to vector<8xf32>
      %118 = vector.shape_cast %117 : vector<8xf32> to vector<8x1xf32>
      %119 = arith.maximumf %116, %118 : vector<8x1xf32>
      %120 = arith.subf %116, %119 : vector<8x1xf32>
      %121 = math.exp %120 : vector<8x1xf32>
      %122 = vector.broadcast %119 : vector<8x1xf32> to vector<8x8xf32>
      %123 = arith.subf %114, %122 : vector<8x8xf32>
      %124 = math.exp %123 : vector<8x8xf32>
      %c2_65 = arith.constant 2 : index
      %c0_66 = arith.constant 0 : index
      %c0_67 = arith.constant 0 : index
      %125 = vector.load %arg8[%c2_65, %c0_66, %c0_67] : memref<4x8x1xf32, #tpu.memory_space<vmem>>, vector<1x8x1xf32>
      %126 = vector.shape_cast %125 : vector<1x8x1xf32> to vector<8x1xf32>
      %127 = arith.mulf %121, %126 : vector<8x1xf32>
      %cst_68 = arith.constant dense<0.000000e+00> : vector<8xf32>
      %128 = vector.multi_reduction <add>, %124, %cst_68 [1] : vector<8x8xf32> to vector<8xf32>
      %129 = vector.shape_cast %128 : vector<8xf32> to vector<8x1xf32>
      %130 = arith.addf %127, %129 : vector<8x1xf32>
      %c2_69 = arith.constant 2 : index
      %c0_70 = arith.constant 0 : index
      %c0_71 = arith.constant 0 : index
      %131 = vector.load %arg8[%c2_69, %c0_70, %c0_71] : memref<4x8x1xf32, #tpu.memory_space<vmem>>, vector<1x8x1xf32>
      %132 = vector.shape_cast %131 : vector<1x8x1xf32> to vector<8x1xf32>
      %133 = vector.shape_cast %130 : vector<8x1xf32> to vector<1x8x1xf32>
      tpu.vector_store %arg8[%c2_69, %c0_70, %c0_71], %133 {strides = array<i32>} : memref<4x8x1xf32, #tpu.memory_space<vmem>>, vector<1x8x1xf32>,
      %c2_72 = arith.constant 2 : index
      %c0_73 = arith.constant 0 : index
      %c0_74 = arith.constant 0 : index
      %134 = vector.load %arg9[%c2_72, %c0_73, %c0_74] : memref<4x8x8xf32, #tpu.memory_space<vmem>>, vector<1x8x8xf32>
      %135 = vector.shape_cast %134 : vector<1x8x8xf32> to vector<8x8xf32>
      %136 = vector.broadcast %121 : vector<8x1xf32> to vector<8x8xf32>
      %137 = arith.mulf %136, %135 : vector<8x8xf32>
      %138 = arith.truncf %124 : vector<8x8xf32> to vector<8x8xbf16>
      %139 = vector.extract_strided_slice %27 {offsets = [0, 16], sizes = [8, 8], strides = [1, 1]} : vector<8x32xbf16> to vector<8x8xbf16>
      %cst_75 = arith.constant dense<0.000000e+00> : vector<8x8xf32>
      %140 = tpu.matmul %138, %139, %cst_75 {dimension_numbers = #tpu.dot_dimension_numbers<[1], [0], [0], [1], [0, 0, 1, 1], [], []>} : vector<8x8xbf16>, vector<8x8xbf16>, vector<8x8xf32> -> vector<8x8xf32>
      %141 = arith.addf %137, %140 : vector<8x8xf32>
      %c2_76 = arith.constant 2 : index
      %c0_77 = arith.constant 0 : index
      %c0_78 = arith.constant 0 : index
      %142 = vector.load %arg9[%c2_76, %c0_77, %c0_78] : memref<4x8x8xf32, #tpu.memory_space<vmem>>, vector<1x8x8xf32>
      %143 = vector.shape_cast %142 : vector<1x8x8xf32> to vector<8x8xf32>
      %144 = vector.shape_cast %141 : vector<8x8xf32> to vector<1x8x8xf32>
      tpu.vector_store %arg9[%c2_76, %c0_77, %c0_78], %144 {strides = array<i32>} : memref<4x8x8xf32, #tpu.memory_space<vmem>>, vector<1x8x8xf32>,
      %c2_79 = arith.constant 2 : index
      %c0_80 = arith.constant 0 : index
      %c0_81 = arith.constant 0 : index
      %145 = vector.load %arg7[%c2_79, %c0_80, %c0_81] : memref<4x8x1xf32, #tpu.memory_space<vmem>>, vector<1x8x1xf32>
      %146 = vector.shape_cast %145 : vector<1x8x1xf32> to vector<8x1xf32>
      %147 = vector.shape_cast %119 : vector<8x1xf32> to vector<1x8x1xf32>
      tpu.vector_store %arg7[%c2_79, %c0_80, %c0_81], %147 {strides = array<i32>} : memref<4x8x1xf32, #tpu.memory_space<vmem>>, vector<1x8x1xf32>,
      %148 = vector.extract_strided_slice %21 {offsets = [0, 24], sizes = [8, 8], strides = [1, 1]} : vector<8x32xbf16> to vector<8x8xbf16>
      %149 = vector.extract_strided_slice %24 {offsets = [0, 24], sizes = [8, 8], strides = [1, 1]} : vector<8x32xbf16> to vector<8x8xbf16>
      %cst_82 = arith.constant dense<0.000000e+00> : vector<8x8xf32>
      %150 = tpu.matmul %148, %149, %cst_82 {dimension_numbers = #tpu.dot_dimension_numbers<[1], [1], [0], [0], [0, 0, 1, 0], [], []>} : vector<8x8xbf16>, vector<8x8xbf16>, vector<8x8xf32> -> vector<8x8xf32>
      %cst_83 = arith.constant 0.353553385 : f32
      %151 = vector.broadcast %cst_83 : f32 to vector<8x8xf32>
      %152 = arith.mulf %150, %151 : vector<8x8xf32>
      %cst_84 = arith.constant -1.000000e+30 : f32
      %153 = vector.broadcast %cst_84 : f32 to vector<8x8xf32>
      %154 = arith.select %18, %152, %153 : vector<8x8xi1>, vector<8x8xf32>
      %c3 = arith.constant 3 : index
      %c0_85 = arith.constant 0 : index
      %c0_86 = arith.constant 0 : index
      %155 = vector.load %arg7[%c3, %c0_85, %c0_86] : memref<4x8x1xf32, #tpu.memory_space<vmem>>, vector<1x8x1xf32>
      %156 = vector.shape_cast %155 : vector<1x8x1xf32> to vector<8x1xf32>
      %cst_87 = arith.constant dense<0xFF800000> : vector<8xf32>
      %157 = vector.multi_reduction <maximumf>, %154, %cst_87 [1] : vector<8x8xf32> to vector<8xf32>
      %158 = vector.shape_cast %157 : vector<8xf32> to vector<8x1xf32>
      %159 = arith.maximumf %156, %158 : vector<8x1xf32>
      %160 = arith.subf %156, %159 : vector<8x1xf32>
      %161 = math.exp %160 : vector<8x1xf32>
      %162 = vector.broadcast %159 : vector<8x1xf32> to vector<8x8xf32>
      %163 = arith.subf %154, %162 : vector<8x8xf32>
      %164 = math.exp %163 : vector<8x8xf32>
      %c3_88 = arith.constant 3 : index
      %c0_89 = arith.constant 0 : index
      %c0_90 = arith.constant 0 : index
      %165 = vector.load %arg8[%c3_88, %c0_89, %c0_90] : memref<4x8x1xf32, #tpu.memory_space<vmem>>, vector<1x8x1xf32>
      %166 = vector.shape_cast %165 : vector<1x8x1xf32> to vector<8x1xf32>
      %167 = arith.mulf %161, %166 : vector<8x1xf32>
      %cst_91 = arith.constant dense<0.000000e+00> : vector<8xf32>
      %168 = vector.multi_reduction <add>, %164, %cst_91 [1] : vector<8x8xf32> to vector<8xf32>
      %169 = vector.shape_cast %168 : vector<8xf32> to vector<8x1xf32>
      %170 = arith.addf %167, %169 : vector<8x1xf32>
      %c3_92 = arith.constant 3 : index
      %c0_93 = arith.constant 0 : index
      %c0_94 = arith.constant 0 : index
      %171 = vector.load %arg8[%c3_92, %c0_93, %c0_94] : memref<4x8x1xf32, #tpu.memory_space<vmem>>, vector<1x8x1xf32>
      %172 = vector.shape_cast %171 : vector<1x8x1xf32> to vector<8x1xf32>
      %173 = vector.shape_cast %170 : vector<8x1xf32> to vector<1x8x1xf32>
      tpu.vector_store %arg8[%c3_92, %c0_93, %c0_94], %173 {strides = array<i32>} : memref<4x8x1xf32, #tpu.memory_space<vmem>>, vector<1x8x1xf32>,
      %c3_95 = arith.constant 3 : index
      %c0_96 = arith.constant 0 : index
      %c0_97 = arith.constant 0 : index
      %174 = vector.load %arg9[%c3_95, %c0_96, %c0_97] : memref<4x8x8xf32, #tpu.memory_space<vmem>>, vector<1x8x8xf32>
      %175 = vector.shape_cast %174 : vector<1x8x8xf32> to vector<8x8xf32>
      %176 = vector.broadcast %161 : vector<8x1xf32> to vector<8x8xf32>
      %177 = arith.mulf %176, %175 : vector<8x8xf32>
      %178 = arith.truncf %164 : vector<8x8xf32> to vector<8x8xbf16>
      %179 = vector.extract_strided_slice %27 {offsets = [0, 24], sizes = [8, 8], strides = [1, 1]} : vector<8x32xbf16> to vector<8x8xbf16>
      %cst_98 = arith.constant dense<0.000000e+00> : vector<8x8xf32>
      %180 = tpu.matmul %178, %179, %cst_98 {dimension_numbers = #tpu.dot_dimension_numbers<[1], [0], [0], [1], [0, 0, 1, 1], [], []>} : vector<8x8xbf16>, vector<8x8xbf16>, vector<8x8xf32> -> vector<8x8xf32>
      %181 = arith.addf %177, %180 : vector<8x8xf32>
      %c3_99 = arith.constant 3 : index
      %c0_100 = arith.constant 0 : index
      %c0_101 = arith.constant 0 : index
      %182 = vector.load %arg9[%c3_99, %c0_100, %c0_101] : memref<4x8x8xf32, #tpu.memory_space<vmem>>, vector<1x8x8xf32>
      %183 = vector.shape_cast %182 : vector<1x8x8xf32> to vector<8x8xf32>
      %184 = vector.shape_cast %181 : vector<8x8xf32> to vector<1x8x8xf32>
      tpu.vector_store %arg9[%c3_99, %c0_100, %c0_101], %184 {strides = array<i32>} : memref<4x8x8xf32, #tpu.memory_space<vmem>>, vector<1x8x8xf32>,
      %c3_102 = arith.constant 3 : index
      %c0_103 = arith.constant 0 : index
      %c0_104 = arith.constant 0 : index
      %185 = vector.load %arg7[%c3_102, %c0_103, %c0_104] : memref<4x8x1xf32, #tpu.memory_space<vmem>>, vector<1x8x1xf32>
      %186 = vector.shape_cast %185 : vector<1x8x1xf32> to vector<8x1xf32>
      %187 = vector.shape_cast %159 : vector<8x1xf32> to vector<1x8x1xf32>
      tpu.vector_store %arg7[%c3_102, %c0_103, %c0_104], %187 {strides = array<i32>} : memref<4x8x1xf32, #tpu.memory_space<vmem>>, vector<1x8x1xf32>,
    } else {
    }
    %c0_i32_3 = arith.constant 0 : i32
    %9 = arith.cmpi eq, %arg2, %c0_i32_3 : i32
    %10 = arith.extui %9 : i1 to i32
    %c0_i32_4 = arith.constant 0 : i32
    %11 = arith.cmpi ne, %10, %c0_i32_4 : i32
    scf.if %11 {
      %c0 = arith.constant 0 : index
      %c0_5 = arith.constant 0 : index
      %c0_6 = arith.constant 0 : index
      %12 = vector.load %arg8[%c0, %c0_5, %c0_6] : memref<4x8x1xf32, #tpu.memory_space<vmem>>, vector<1x8x1xf32>
      %13 = vector.shape_cast %12 : vector<1x8x1xf32> to vector<8x1xf32>
      %14 = tpu.reciprocal %13 {approx = true} : vector<8x1xf32> -> vector<8x1xf32>
      %c0_7 = arith.constant 0 : index
      %c0_8 = arith.constant 0 : index
      %c0_9 = arith.constant 0 : index
      %15 = vector.load %arg9[%c0_7, %c0_8, %c0_9] : memref<4x8x8xf32, #tpu.memory_space<vmem>>, vector<1x8x8xf32>
      %16 = vector.shape_cast %15 : vector<1x8x8xf32> to vector<8x8xf32>
      %17 = vector.broadcast %14 : vector<8x1xf32> to vector<8x8xf32>
      %18 = arith.mulf %16, %17 : vector<8x8xf32>
      %c1 = arith.constant 1 : index
      %c0_10 = arith.constant 0 : index
      %c0_11 = arith.constant 0 : index
      %19 = vector.load %arg8[%c1, %c0_10, %c0_11] : memref<4x8x1xf32, #tpu.memory_space<vmem>>, vector<1x8x1xf32>
      %20 = vector.shape_cast %19 : vector<1x8x1xf32> to vector<8x1xf32>
      %21 = tpu.reciprocal %20 {approx = true} : vector<8x1xf32> -> vector<8x1xf32>
      %c1_12 = arith.constant 1 : index
      %c0_13 = arith.constant 0 : index
      %c0_14 = arith.constant 0 : index
      %22 = vector.load %arg9[%c1_12, %c0_13, %c0_14] : memref<4x8x8xf32, #tpu.memory_space<vmem>>, vector<1x8x8xf32>
      %23 = vector.shape_cast %22 : vector<1x8x8xf32> to vector<8x8xf32>
      %24 = vector.broadcast %21 : vector<8x1xf32> to vector<8x8xf32>
      %25 = arith.mulf %23, %24 : vector<8x8xf32>
      %c2 = arith.constant 2 : index
      %c0_15 = arith.constant 0 : index
      %c0_16 = arith.constant 0 : index
      %26 = vector.load %arg8[%c2, %c0_15, %c0_16] : memref<4x8x1xf32, #tpu.memory_space<vmem>>, vector<1x8x1xf32>
      %27 = vector.shape_cast %26 : vector<1x8x1xf32> to vector<8x1xf32>
      %28 = tpu.reciprocal %27 {approx = true} : vector<8x1xf32> -> vector<8x1xf32>
      %c2_17 = arith.constant 2 : index
      %c0_18 = arith.constant 0 : index
      %c0_19 = arith.constant 0 : index
      %29 = vector.load %arg9[%c2_17, %c0_18, %c0_19] : memref<4x8x8xf32, #tpu.memory_space<vmem>>, vector<1x8x8xf32>
      %30 = vector.shape_cast %29 : vector<1x8x8xf32> to vector<8x8xf32>
      %31 = vector.broadcast %28 : vector<8x1xf32> to vector<8x8xf32>
      %32 = arith.mulf %30, %31 : vector<8x8xf32>
      %c3 = arith.constant 3 : index
      %c0_20 = arith.constant 0 : index
      %c0_21 = arith.constant 0 : index
      %33 = vector.load %arg8[%c3, %c0_20, %c0_21] : memref<4x8x1xf32, #tpu.memory_space<vmem>>, vector<1x8x1xf32>
      %34 = vector.shape_cast %33 : vector<1x8x1xf32> to vector<8x1xf32>
      %35 = tpu.reciprocal %34 {approx = true} : vector<8x1xf32> -> vector<8x1xf32>
      %c3_22 = arith.constant 3 : index
      %c0_23 = arith.constant 0 : index
      %c0_24 = arith.constant 0 : index
      %36 = vector.load %arg9[%c3_22, %c0_23, %c0_24] : memref<4x8x8xf32, #tpu.memory_space<vmem>>, vector<1x8x8xf32>
      %37 = vector.shape_cast %36 : vector<1x8x8xf32> to vector<8x8xf32>
      %38 = vector.broadcast %35 : vector<8x1xf32> to vector<8x8xf32>
      %39 = arith.mulf %37, %38 : vector<8x8xf32>
      %40 = tpu.concatenate %18, %25, %32, %39 in 1 : vector<8x8xf32>, vector<8x8xf32>, vector<8x8xf32>, vector<8x8xf32> -> vector<8x32xf32>
      %c0_25 = arith.constant 0 : index
      %c0_26 = arith.constant 0 : index
      %c0_27 = arith.constant 0 : index
      %41 = vector.load %arg6[%c0_25, %c0_26, %c0_27] : memref<1x8x32xf32, #tpu.memory_space<vmem>>, vector<1x8x32xf32>
      %42 = vector.shape_cast %41 : vector<1x8x32xf32> to vector<8x32xf32>
      %43 = vector.shape_cast %40 : vector<8x32xf32> to vector<1x8x32xf32>
      tpu.vector_store %arg6[%c0_25, %c0_26, %c0_27], %43 {strides = array<i32>} : memref<1x8x32xf32, #tpu.memory_space<vmem>>, vector<1x8x32xf32>,
    } else {
    }
    return
  }
  func.func @transform_0(%arg0: i32, %arg1: i32, %arg2: i32) -> (i32, i32, i32) {
    %c0_i32 = arith.constant 0 : i32
    %c0_i32_0 = arith.constant 0 : i32
    return %arg0, %arg1, %c0_i32 : i32, i32, i32
  }
  func.func @transform_1(%arg0: i32, %arg1: i32, %arg2: i32) -> (i32, i32, i32) {
    %c0_i32 = arith.constant 0 : i32
    %c0_i32_0 = arith.constant 0 : i32
    return %arg0, %arg2, %c0_i32 : i32, i32, i32
  }
  func.func @transform_2(%arg0: i32, %arg1: i32, %arg2: i32) -> (i32, i32, i32) {
    %c0_i32 = arith.constant 0 : i32
    %c0_i32_0 = arith.constant 0 : i32
    return %arg0, %arg2, %c0_i32 : i32, i32, i32
  }
  func.func @transform_3(%arg0: i32, %arg1: i32, %arg2: i32) -> (i32, i32, i32) {
    %c0_i32 = arith.constant 0 : i32
    %c0_i32_0 = arith.constant 0 : i32
    return %arg0, %arg1, %c0_i32 : i32, i32, i32
  }
}

module attributes {stable_mosaic.version = 11 : i64} {
  func.func @kernel(%arg0: i32, %arg1: i32, %arg2: memref<16x32xf32, #tpu.memory_space<vmem>>, %arg3: memref<1x32xf32, #tpu.memory_space<vmem>>, %arg4: memref<1x32xf32, #tpu.memory_space<vmem>>, %arg5: memref<32x128xf32, #tpu.memory_space<vmem>>, %arg6: memref<16x128xf32, #tpu.memory_space<vmem>>) attributes {dimension_semantics = [#tpu.dimension_semantics<parallel>, #tpu.dimension_semantics<parallel>], iteration_bounds = array<i64: 1, 1>, scalar_prefetch = 0 : i64, scratch_operands = 0 : i64, tpu.core_type = #tpu.core_type<tc>, window_params = [{transform_indices = @transform_0, window_bounds = array<i64: 16, 32>}, {pipeline_mode = #tpu.pipeline_mode<synchronous>, transform_indices = @transform_1, window_bounds = array<i64: 1, 32>}, {pipeline_mode = #tpu.pipeline_mode<synchronous>, transform_indices = @transform_2, window_bounds = array<i64: 1, 32>}, {transform_indices = @transform_3, window_bounds = array<i64: 32, 128>}, {transform_indices = @transform_4, window_bounds = array<i64: 16, 128>}]} {
    %c0 = arith.constant 0 : index
    %c0_0 = arith.constant 0 : index
    %0 = vector.load %arg2[%c0, %c0_0] : memref<16x32xf32, #tpu.memory_space<vmem>>, vector<16x32xf32>
    %cst = arith.constant dense<0.000000e+00> : vector<16xf32>
    %1 = vector.multi_reduction <add>, %0, %cst [1] : vector<16x32xf32> to vector<16xf32>
    %2 = vector.shape_cast %1 : vector<16xf32> to vector<16x1xf32>
    %cst_1 = arith.constant 3.200000e+01 : f32
    %3 = vector.broadcast %cst_1 : f32 to vector<16x1xf32>
    %4 = arith.divf %2, %3 : vector<16x1xf32>
    %5 = vector.broadcast %4 : vector<16x1xf32> to vector<16x32xf32>
    %6 = arith.subf %0, %5 : vector<16x32xf32>
    %7 = arith.mulf %6, %6 : vector<16x32xf32>
    %cst_2 = arith.constant dense<0.000000e+00> : vector<16xf32>
    %8 = vector.multi_reduction <add>, %7, %cst_2 [1] : vector<16x32xf32> to vector<16xf32>
    %9 = vector.shape_cast %8 : vector<16xf32> to vector<16x1xf32>
    %cst_3 = arith.constant 3.200000e+01 : f32
    %10 = vector.broadcast %cst_3 : f32 to vector<16x1xf32>
    %11 = arith.divf %9, %10 : vector<16x1xf32>
    %12 = vector.broadcast %4 : vector<16x1xf32> to vector<16x32xf32>
    %13 = arith.subf %0, %12 : vector<16x32xf32>
    %cst_4 = arith.constant 9.99999974E-6 : f32
    %14 = vector.broadcast %cst_4 : f32 to vector<16x1xf32>
    %15 = arith.addf %11, %14 : vector<16x1xf32>
    %16 = math.rsqrt %15 : vector<16x1xf32>
    %17 = vector.broadcast %16 : vector<16x1xf32> to vector<16x32xf32>
    %18 = arith.mulf %13, %17 : vector<16x32xf32>
    %c0_5 = arith.constant 0 : index
    %c0_6 = arith.constant 0 : index
    %19 = vector.load %arg3[%c0_5, %c0_6] : memref<1x32xf32, #tpu.memory_space<vmem>>, vector<1x32xf32>
    %20 = vector.broadcast %19 : vector<1x32xf32> to vector<16x32xf32>
    %21 = arith.mulf %18, %20 : vector<16x32xf32>
    %c0_7 = arith.constant 0 : index
    %c0_8 = arith.constant 0 : index
    %22 = vector.load %arg4[%c0_7, %c0_8] : memref<1x32xf32, #tpu.memory_space<vmem>>, vector<1x32xf32>
    %23 = vector.broadcast %22 : vector<1x32xf32> to vector<16x32xf32>
    %24 = arith.addf %21, %23 : vector<16x32xf32>
    %25 = arith.truncf %24 : vector<16x32xf32> to vector<16x32xbf16>
    %c0_9 = arith.constant 0 : index
    %c0_10 = arith.constant 0 : index
    %26 = vector.load %arg5[%c0_9, %c0_10] : memref<32x128xf32, #tpu.memory_space<vmem>>, vector<32x128xf32>
    %27 = arith.truncf %26 : vector<32x128xf32> to vector<32x128xbf16>
    %cst_11 = arith.constant dense<0.000000e+00> : vector<16x128xf32>
    %28 = tpu.matmul %25, %27, %cst_11 {dimension_numbers = #tpu.dot_dimension_numbers<[1], [0], [0], [1], [0, 0, 1, 1], [], []>} : vector<16x32xbf16>, vector<32x128xbf16>, vector<16x128xf32> -> vector<16x128xf32>
    %c0_12 = arith.constant 0 : index
    %c0_13 = arith.constant 0 : index
    %29 = vector.load %arg6[%c0_12, %c0_13] : memref<16x128xf32, #tpu.memory_space<vmem>>, vector<16x128xf32>
    tpu.vector_store %arg6[%c0_12, %c0_13], %28 {strides = array<i32>} : memref<16x128xf32, #tpu.memory_space<vmem>>, vector<16x128xf32>,
    return
  }
  func.func @transform_0(%arg0: i32, %arg1: i32) -> (i32, i32) {
    %c0_i32 = arith.constant 0 : i32
    %c0_i32_0 = arith.constant 0 : i32
    return %arg0, %c0_i32 : i32, i32
  }
  func.func @transform_1(%arg0: i32, %arg1: i32) -> (i32, i32) {
    %c0_i32 = arith.constant 0 : i32
    %c0_i32_0 = arith.constant 0 : i32
    %c0_i32_1 = arith.constant 0 : i32
    return %c0_i32, %c0_i32_0 : i32, i32
  }
  func.func @transform_2(%arg0: i32, %arg1: i32) -> (i32, i32) {
    %c0_i32 = arith.constant 0 : i32
    %c0_i32_0 = arith.constant 0 : i32
    %c0_i32_1 = arith.constant 0 : i32
    return %c0_i32, %c0_i32_0 : i32, i32
  }
  func.func @transform_3(%arg0: i32, %arg1: i32) -> (i32, i32) {
    %c0_i32 = arith.constant 0 : i32
    %c0_i32_0 = arith.constant 0 : i32
    return %c0_i32, %arg1 : i32, i32
  }
  func.func @transform_4(%arg0: i32, %arg1: i32) -> (i32, i32) {
    %c0_i32 = arith.constant 0 : i32
    return %arg0, %arg1 : i32, i32
  }
}

module attributes {stable_mosaic.version = 11 : i64} {
  func.func @_linear_kernel(%arg0: i32, %arg1: i32, %arg2: i32, %arg3: memref<16x128xf32, #tpu.memory_space<vmem>>, %arg4: memref<128x32xf32, #tpu.memory_space<vmem>>, %arg5: memref<1x32xf32, #tpu.memory_space<vmem>>, %arg6: memref<16x32xf32, #tpu.memory_space<vmem>>, %arg7: memref<16x32xf32, #tpu.memory_space<vmem>>) attributes {dimension_semantics = [#tpu.dimension_semantics<parallel>, #tpu.dimension_semantics<parallel>, #tpu.dimension_semantics<arbitrary>], iteration_bounds = array<i64: 1, 1, 1>, scalar_prefetch = 0 : i64, scratch_operands = 1 : i64, tpu.core_type = #tpu.core_type<tc>, window_params = [{transform_indices = @transform_0, window_bounds = array<i64: 16, 128>}, {transform_indices = @transform_1, window_bounds = array<i64: 128, 32>}, {transform_indices = @transform_2, window_bounds = array<i64: 1, 32>}, {transform_indices = @transform_3, window_bounds = array<i64: 16, 32>}]} {
    %c0_i32 = arith.constant 0 : i32
    %0 = arith.cmpi eq, %arg2, %c0_i32 : i32
    %1 = arith.extui %0 : i1 to i32
    %c0_i32_0 = arith.constant 0 : i32
    %2 = arith.cmpi ne, %1, %c0_i32_0 : i32
    scf.if %2 {
      %cst_10 = arith.constant 0.000000e+00 : f32
      %14 = vector.broadcast %cst_10 : f32 to vector<16x32xf32>
      %c0_11 = arith.constant 0 : index
      %c0_12 = arith.constant 0 : index
      %15 = vector.load %arg7[%c0_11, %c0_12] : memref<16x32xf32, #tpu.memory_space<vmem>>, vector<16x32xf32>
      tpu.vector_store %arg7[%c0_11, %c0_12], %14 {strides = array<i32>} : memref<16x32xf32, #tpu.memory_space<vmem>>, vector<16x32xf32>,
    } else {
    }
    %c0 = arith.constant 0 : index
    %c0_1 = arith.constant 0 : index
    %3 = vector.load %arg7[%c0, %c0_1] : memref<16x32xf32, #tpu.memory_space<vmem>>, vector<16x32xf32>
    %c0_2 = arith.constant 0 : index
    %c0_3 = arith.constant 0 : index
    %4 = vector.load %arg3[%c0_2, %c0_3] : memref<16x128xf32, #tpu.memory_space<vmem>>, vector<16x128xf32>
    %5 = arith.truncf %4 : vector<16x128xf32> to vector<16x128xbf16>
    %c0_4 = arith.constant 0 : index
    %c0_5 = arith.constant 0 : index
    %6 = vector.load %arg4[%c0_4, %c0_5] : memref<128x32xf32, #tpu.memory_space<vmem>>, vector<128x32xf32>
    %7 = arith.truncf %6 : vector<128x32xf32> to vector<128x32xbf16>
    %cst = arith.constant dense<0.000000e+00> : vector<16x32xf32>
    %8 = tpu.matmul %5, %7, %cst {dimension_numbers = #tpu.dot_dimension_numbers<[1], [0], [0], [1], [0, 0, 1, 1], [], []>} : vector<16x128xbf16>, vector<128x32xbf16>, vector<16x32xf32> -> vector<16x32xf32>
    %9 = arith.addf %3, %8 : vector<16x32xf32>
    %c0_6 = arith.constant 0 : index
    %c0_7 = arith.constant 0 : index
    %10 = vector.load %arg7[%c0_6, %c0_7] : memref<16x32xf32, #tpu.memory_space<vmem>>, vector<16x32xf32>
    tpu.vector_store %arg7[%c0_6, %c0_7], %9 {strides = array<i32>} : memref<16x32xf32, #tpu.memory_space<vmem>>, vector<16x32xf32>,
    %c0_i32_8 = arith.constant 0 : i32
    %11 = arith.cmpi eq, %arg2, %c0_i32_8 : i32
    %12 = arith.extui %11 : i1 to i32
    %c0_i32_9 = arith.constant 0 : i32
    %13 = arith.cmpi ne, %12, %c0_i32_9 : i32
    scf.if %13 {
      %c0_10 = arith.constant 0 : index
      %c0_11 = arith.constant 0 : index
      %14 = vector.load %arg7[%c0_10, %c0_11] : memref<16x32xf32, #tpu.memory_space<vmem>>, vector<16x32xf32>
      %c0_12 = arith.constant 0 : index
      %c0_13 = arith.constant 0 : index
      %15 = vector.load %arg5[%c0_12, %c0_13] : memref<1x32xf32, #tpu.memory_space<vmem>>, vector<1x32xf32>
      %16 = vector.broadcast %15 : vector<1x32xf32> to vector<16x32xf32>
      %17 = arith.addf %14, %16 : vector<16x32xf32>
      %c0_14 = arith.constant 0 : index
      %c0_15 = arith.constant 0 : index
      %18 = vector.load %arg6[%c0_14, %c0_15] : memref<16x32xf32, #tpu.memory_space<vmem>>, vector<16x32xf32>
      tpu.vector_store %arg6[%c0_14, %c0_15], %17 {strides = array<i32>} : memref<16x32xf32, #tpu.memory_space<vmem>>, vector<16x32xf32>,
    } else {
    }
    return
  }
  func.func @transform_0(%arg0: i32, %arg1: i32, %arg2: i32) -> (i32, i32) {
    %c0_i32 = arith.constant 0 : i32
    return %arg0, %arg2 : i32, i32
  }
  func.func @transform_1(%arg0: i32, %arg1: i32, %arg2: i32) -> (i32, i32) {
    %c0_i32 = arith.constant 0 : i32
    return %arg2, %arg1 : i32, i32
  }
  func.func @transform_2(%arg0: i32, %arg1: i32, %arg2: i32) -> (i32, i32) {
    %c0_i32 = arith.constant 0 : i32
    %c0_i32_0 = arith.constant 0 : i32
    return %c0_i32, %arg1 : i32, i32
  }
  func.func @transform_3(%arg0: i32, %arg1: i32, %arg2: i32) -> (i32, i32) {
    %c0_i32 = arith.constant 0 : i32
    return %arg0, %arg1 : i32, i32
  }
}

</mosaic_0001>

<bundles_post_ra>
// kernel: gpt_forward.14
= control target key start
LH: loop header
LB: loop body
LE: loop exit
PB: predicated region body
PF: predicated region fallthrough
CT: control target
= control target key end

     0   :  { %vm23_vm0 = vcmask 261120   ;;  %v176_v17 = vmov 0.0   ;;  %vm177_vm1 = vmmov 0   ;;  %s246_s0 = inlined_call_operand.vmem [shape: f32[16,32], index: 0, kind: input, shape index: {}]   ;;  %s247_s3 = inlined_call_operand.vmem [shape: f32[32,128], index: 3, kind: input, shape index: {}]   ;;  %s248_s1 = inlined_call_operand.vmem [shape: f32[1,32], index: 1, kind: input, shape index: {}]   ;;  %s249_s2 = inlined_call_operand.vmem [shape: f32[1,32], index: 2, kind: input, shape index: {}]   ;;  %s250_s4 = inlined_call_operand.vmem [shape: f32[1,128], index: 4, kind: input, shape index: {}]   ;;  %s251_s5 = inlined_call_operand.vmem [shape: f32[16,128], index: 5, kind: output, shape index: {}]  }
   0x1   :  { %v21_v0 = vld [vmem:[%s246_s0] sm:$0xff]  ;;  %v22_v1 = vld [vmem:[%s246_s0 + $0x8] sm:$0xff]  ;;  %158 = vmatprep.subr.bf16.mxu0 %v176_v17  ;;  %v72_v18 = vld [vmem:[%s247_s3 + $0x10] sm:$0xff]  ;;  %162 = vmatprep.mubr.msk.bf16.mxu0 %vm177_vm1, %v176_v17 }
   0x2   :  { %v24_v2 = vsel %vm23_vm0, %v21_v0, 0.0  ;;  %v27_v3 = vsel %vm23_vm0, %v22_v1, 0.0  ;;  %v70_v14 = vld [vmem:[%s247_s3] sm:$0xff]  ;;  %v71_v15 = vld [vmem:[%s247_s3 + $0x8] sm:$0xff]  ;;  %v73_v19 = vld [vmem:[%s247_s3 + $0x18] sm:$0xff] }
   0x3   :  { %25 = vadd.xlane.f32.xlu0 %v24_v2  ;;  %v74_v16 = vpack.c.bf16 %v71_v15, %v70_v14  ;;  %v75_v20 = vpack.c.bf16 %v73_v19, %v72_v18  ;;  %v151_v29 = vld [vmem:[%s248_s1] ss:$0 sm:$0xff] }
   0x4   :  { %v152_v33 = vld [vmem:[%s249_s2] ss:$0 sm:$0xff] }
   0x5   :  { %159 = vmatpush3.bf16.msra.mxu0 %v74_v16  ;;  %v153_v38 = vld [vmem:[%s250_s4] ss:$0 sm:$0xff] }
   0x6   :  { %160 = vmatprep.subr.bf16.mxu0 %v176_v17 }
   0x7   :  { %28 = vadd.xlane.f32.xlu0 %v27_v3 }
   0x9   :  { %161 = vmatpush3.bf16.msra.mxu0 %v75_v20 }
  0x90   :  { %v26_v4 = vpop.xlane.xlu0 %25 }
  0x91   :  { %v31_v5 = vmul.f32 0.03125, %v26_v4 }
  0x93   :  { %v33_v6 = vsub.f32 %v21_v0, %v31_v5 }
  0x94   :  { %v29_v7 = vpop.xlane.xlu0 %28 }
  0x95   :  { %v32_v8 = vmul.f32 0.03125, %v29_v7  ;;  %v35_v9 = vmul.f32 %v33_v6, %v33_v6 }
  0x97   :  { %v34_v10 = vsub.f32 %v22_v1, %v32_v8  ;;  %v37_v11 = vsel %vm23_vm0, %v35_v9, 0.0 }
  0x98   :  { %38 = vadd.xlane.f32.xlu1 %v37_v11 }
  0x99   :  { %v36_v12 = vmul.f32 %v34_v10, %v34_v10 }
  0x9b   :  { %v40_v13 = vsel %vm23_vm0, %v36_v12, 0.0 }
  0x9c   :  { %41 = vadd.xlane.f32.xlu1 %v40_v13 }
 0x125   :  { %v39_v21 = vpop.xlane.xlu1 %38 }
 0x126   :  { %v43_v22 = vmul.f32 0.03125, %v39_v21 }
 0x128   :  { %v45_v23 = vadd.f32 1e-05, %v43_v22 }
 0x129   :  { %v42_v24 = vpop.xlane.xlu1 %41 }
 0x12a   :  { %168 = vrsqrt.f32 %v45_v23  ;;  %v44_v25 = vmul.f32 0.03125, %v42_v24 }
 0x12c   :  { %v46_v26 = vadd.f32 1e-05, %v44_v25 }
 0x12e   :  { %170 = vrsqrt.f32 %v46_v26 }
 0x134   :  { %v169_v27 = vpop.eup %168 }
 0x135   :  { %v49_v28 = vmul.f32 %v169_v27, %v33_v6 }
 0x137   :  { %v58_v32 = vmul.f32 %v151_v29, %v49_v28 }
 0x138   :  { %v171_v30 = vpop.eup %170 }
 0x139   :  { %v50_v31 = vmul.f32 %v171_v30, %v34_v10  ;;  %v67_v35 = vadd.f32 %v152_v33, %v58_v32 }
 0x13b   :  { %v59_v34 = vmul.f32 %v151_v29, %v50_v31 }
 0x13d   :  { %v68_v36 = vadd.f32 %v152_v33, %v59_v34 }
 0x13f   :  { %v69_v37 = vpack.c.bf16 %v68_v36, %v67_v35 }
 0x141   :  { %163 = vmatmul.mubr.msk.bf16.vlgmr.msra.gmra.mrb[0].mxu0 %vm23_vm0, %v69_v37 }
 0x214   :  { %v120_v39 = vpop.f32.mrb[0].mxu0 }
 0x215   :  { %v121_v40 = vadd.f32 %v153_v38, %v120_v39  ;;  %v164_v41 = vpop.f32.mrb[1].mxu0 }
 0x216   :  { %v123_v42 = vpop.f32.mrb[2].mxu0 }
 0x217   :  { %v129_v43 = vmul.f32 0.044715, %v121_v40  ;;  %v124_v44 = vadd.f32 %v153_v38, %v123_v42  ;;  %v165_v45 = vpop.f32.mrb[3].mxu0  ;;  %v127_v56 = vmul.f32 0.5, %v121_v40 }
 0x219   :  { %v131_v46 = vmul.f32 %v129_v43, %v121_v40  ;;  %v130_v47 = vmul.f32 0.044715, %v124_v44  ;;  %v128_v60 = vmul.f32 0.5, %v124_v44 }
 0x21b   :  { %v133_v48 = vmul.f32 %v131_v46, %v121_v40  ;;  %v132_v49 = vmul.f32 %v130_v47, %v124_v44 }
 0x21d   :  { %v135_v50 = vadd.f32 %v133_v48, %v121_v40  ;;  %v134_v51 = vmul.f32 %v132_v49, %v124_v44 }
 0x21f   :  { %v137_v52 = vmul.f32 0.7978846, %v135_v50  ;;  %v136_v53 = vadd.f32 %v134_v51, %v124_v44 }
 0x221   :  { %172 = vtanh.f32 %v137_v52  ;;  %v138_v54 = vmul.f32 0.7978846, %v136_v53 }
 0x223   :  { %174 = vtanh.f32 %v138_v54 }
 0x22b   :  { %v173_v55 = vpop.eup %172 }
 0x22c   :  { %v141_v57 = vadd.f32 1.0, %v173_v55 }
 0x22d   :  { %v175_v58 = vpop.eup %174 }
 0x22e   :  { %v143_v59 = vmul.f32 %v141_v57, %v127_v56  ;;  %v142_v61 = vadd.f32 1.0, %v175_v58 }
 0x230   :  { %145 = vst [vmem:[%s251_s5] sm:$0xff] %v143_v59  ;;  %v144_v62 = vmul.f32 %v142_v61, %v128_v60 }
 0x232   :  { %146 = vst [vmem:[%s251_s5 + $0x8] sm:$0xff] %v144_v62 }

// kernel: gpt_forward.13
= control target key start
LH: loop header
LB: loop body
LE: loop exit
PB: predicated region body
PF: predicated region fallthrough
CT: control target
= control target key end

     0   :  { %vm19_vm0 = vcmask 261120   ;;  %v117_v0 = vmov 0.0   ;;  %vm118_vm1 = vmmov 0   ;;  %s173_s1 = inlined_call_operand.vmem [shape: f32[32,32], index: 1, kind: input, shape index: {}]   ;;  %s174_s0 = inlined_call_operand.vmem [shape: f32[16,32], index: 0, kind: input, shape index: {}]   ;;  %s175_s2 = inlined_call_operand.vmem [shape: f32[1,32], index: 2, kind: input, shape index: {}]   ;;  %s176_s3 = inlined_call_operand.vmem [shape: f32[16,32], index: 3, kind: output, shape index: {}]  }
   0x1   :  { %107 = vmatprep.subr.bf16.mxu0 %v117_v0  ;;  %v27_v1 = vld [vmem:[%s173_s1] sm:$0xff]  ;;  %v28_v2 = vld [vmem:[%s173_s1 + $0x8] sm:$0xff]  ;;  %v29_v3 = vld [vmem:[%s173_s1 + $0x10] sm:$0xff]  ;;  %111 = vmatprep.mubr.msk.bf16.mxu0 %vm118_vm1, %v117_v0  ;;  %20 = vst.msk [vmem:[#allocation2] sm:$0xff] %vm19_vm0, %v117_v0 }
   0x2   :  { %21 = vst.msk [vmem:[#allocation2 + $0x8] sm:$0xff] %vm19_vm0, %v117_v0  ;;  %v31_v4 = vpack.c.bf16 %v28_v2, %v27_v1  ;;  %v30_v5 = vld [vmem:[%s173_s1 + $0x18] sm:$0xff]  ;;  %v24_v7 = vld [vmem:[%s174_s0] sm:$0xff]  ;;  %v25_v8 = vld [vmem:[%s174_s0 + $0x8] sm:$0xff] }
   0x3   :  { %v32_v6 = vpack.c.bf16 %v30_v5, %v29_v3  ;;  %v26_v9 = vpack.c.bf16 %v25_v8, %v24_v7  ;;  %v103_v18 = vld [vmem:[%s175_s2] ss:$0 sm:$0xff] }
   0x4   :  { %108 = vmatpush3.bf16.msra.mxu0 %v31_v4 }
   0x5   :  { %109 = vmatprep.subr.bf16.mxu0 %v117_v0 }
   0x8   :  { %110 = vmatpush3.bf16.msra.mxu0 %v32_v6  ;;  %v22_v10 = vld [vmem:[#allocation2] sm:$0xff] }
   0x9   :  { %v23_v12 = vld [vmem:[#allocation2 + $0x8] sm:$0xff] }
   0xb   :  { %112 = vmatmul.mubr.msk.bf16.vlgmr.msra.gmra.mrb[0].mxu0 %vm19_vm0, %v26_v9 }
  0xde   :  { %v71_v11 = vpop.f32.mrb[0].mxu0 }
  0xdf   :  { %v78_v13 = vadd.f32 %v71_v11, %v22_v10  ;;  %v113_v14 = vpop.f32.mrb[1].mxu0 }
  0xe0   :  { %v74_v15 = vpop.f32.mrb[2].mxu0 }
  0xe1   :  { %80 = vst.msk [vmem:[#allocation2] sm:$0xff] %vm19_vm0, %v78_v13  ;;  %v79_v16 = vadd.f32 %v74_v15, %v23_v12  ;;  %v114_v17 = vpop.f32.mrb[3].mxu0 }
  0xe3   :  { %81 = vst.msk [vmem:[#allocation2 + $0x8] sm:$0xff] %vm19_vm0, %v79_v16 }
  0xe8   :  { %v85_v19 = vld [vmem:[#allocation2] sm:$0xff] }
  0xe9   :  { %v94_v20 = vadd.f32 %v103_v18, %v85_v19 }
  0xea   :  { %v86_v21 = vld [vmem:[#allocation2 + $0x8] sm:$0xff] }
  0xeb   :  { %96 = vst.msk [vmem:[%s176_s3] sm:$0xff] %vm19_vm0, %v94_v20  ;;  %v95_v22 = vadd.f32 %v103_v18, %v86_v21 }
  0xed   :  { %97 = vst.msk [vmem:[%s176_s3 + $0x8] sm:$0xff] %vm19_vm0, %v95_v22 }

// kernel: gpt_forward.11
= control target key start
LH: loop header
LB: loop body
LE: loop exit
PB: predicated region body
PF: predicated region fallthrough
CT: control target
= control target key end

     0   :  { %vm23_vm0 = vcmask 261120   ;;  %v155_v17 = vmov 0.0   ;;  %vm156_vm1 = vmmov 0   ;;  %vm127_vm2 = vcmask 785408   ;;  %s225_s0 = inlined_call_operand.vmem [shape: f32[16,32], index: 0, kind: input, shape index: {}]   ;;  %s226_s3 = inlined_call_operand.vmem [shape: f32[32,96], index: 3, kind: input, shape index: {}]   ;;  %s227_s1 = inlined_call_operand.vmem [shape: f32[1,32], index: 1, kind: input, shape index: {}]   ;;  %s228_s2 = inlined_call_operand.vmem [shape: f32[1,32], index: 2, kind: input, shape index: {}]   ;;  %s229_s4 = inlined_call_operand.vmem [shape: f32[1,96], index: 4, kind: input, shape index: {}]   ;;  %s230_s5 = inlined_call_operand.vmem [shape: f32[16,96], index: 5, kind: output, shape index: {}]  }
   0x1   :  { %v21_v0 = vld [vmem:[%s225_s0] sm:$0xff]  ;;  %v22_v1 = vld [vmem:[%s225_s0 + $0x8] sm:$0xff]  ;;  %141 = vmatprep.subr.bf16.mxu0 %v155_v17  ;;  %v72_v18 = vld [vmem:[%s226_s3 + $0x10] sm:$0xff]  ;;  %145 = vmatprep.mubr.msk.bf16.mxu0 %vm156_vm1, %v155_v17 }
   0x2   :  { %v24_v2 = vsel %vm23_vm0, %v21_v0, 0.0  ;;  %v27_v3 = vsel %vm23_vm0, %v22_v1, 0.0  ;;  %v70_v14 = vld [vmem:[%s226_s3] sm:$0xff]  ;;  %v71_v15 = vld [vmem:[%s226_s3 + $0x8] sm:$0xff]  ;;  %v73_v19 = vld [vmem:[%s226_s3 + $0x18] sm:$0xff] }
   0x3   :  { %25 = vadd.xlane.f32.xlu0 %v24_v2  ;;  %v74_v16 = vpack.c.bf16 %v71_v15, %v70_v14  ;;  %v75_v20 = vpack.c.bf16 %v73_v19, %v72_v18  ;;  %v134_v29 = vld [vmem:[%s227_s1] ss:$0 sm:$0xff] }
   0x4   :  { %v135_v33 = vld [vmem:[%s228_s2] ss:$0 sm:$0xff] }
   0x5   :  { %142 = vmatpush3.bf16.msra.mxu0 %v74_v16  ;;  %v136_v38 = vld [vmem:[%s229_s4] ss:$0 sm:$0xff] }
   0x6   :  { %143 = vmatprep.subr.bf16.mxu0 %v155_v17 }
   0x7   :  { %28 = vadd.xlane.f32.xlu0 %v27_v3 }
   0x9   :  { %144 = vmatpush3.bf16.msra.mxu0 %v75_v20 }
  0x90   :  { %v26_v4 = vpop.xlane.xlu0 %25 }
  0x91   :  { %v31_v5 = vmul.f32 0.03125, %v26_v4 }
  0x93   :  { %v33_v6 = vsub.f32 %v21_v0, %v31_v5 }
  0x94   :  { %v29_v7 = vpop.xlane.xlu0 %28 }
  0x95   :  { %v32_v8 = vmul.f32 0.03125, %v29_v7  ;;  %v35_v9 = vmul.f32 %v33_v6, %v33_v6 }
  0x97   :  { %v34_v10 = vsub.f32 %v22_v1, %v32_v8  ;;  %v37_v11 = vsel %vm23_vm0, %v35_v9, 0.0 }
  0x98   :  { %38 = vadd.xlane.f32.xlu1 %v37_v11 }
  0x99   :  { %v36_v12 = vmul.f32 %v34_v10, %v34_v10 }
  0x9b   :  { %v40_v13 = vsel %vm23_vm0, %v36_v12, 0.0 }
  0x9c   :  { %41 = vadd.xlane.f32.xlu1 %v40_v13 }
 0x125   :  { %v39_v21 = vpop.xlane.xlu1 %38 }
 0x126   :  { %v43_v22 = vmul.f32 0.03125, %v39_v21 }
 0x128   :  { %v45_v23 = vadd.f32 1e-05, %v43_v22 }
 0x129   :  { %v42_v24 = vpop.xlane.xlu1 %41 }
 0x12a   :  { %151 = vrsqrt.f32 %v45_v23  ;;  %v44_v25 = vmul.f32 0.03125, %v42_v24 }
 0x12c   :  { %v46_v26 = vadd.f32 1e-05, %v44_v25 }
 0x12e   :  { %153 = vrsqrt.f32 %v46_v26 }
 0x134   :  { %v152_v27 = vpop.eup %151 }
 0x135   :  { %v49_v28 = vmul.f32 %v152_v27, %v33_v6 }
 0x137   :  { %v58_v32 = vmul.f32 %v134_v29, %v49_v28 }
 0x138   :  { %v154_v30 = vpop.eup %153 }
 0x139   :  { %v50_v31 = vmul.f32 %v154_v30, %v34_v10  ;;  %v67_v35 = vadd.f32 %v135_v33, %v58_v32 }
 0x13b   :  { %v59_v34 = vmul.f32 %v134_v29, %v50_v31 }
 0x13d   :  { %v68_v36 = vadd.f32 %v135_v33, %v59_v34 }
 0x13f   :  { %v69_v37 = vpack.c.bf16 %v68_v36, %v67_v35 }
 0x141   :  { %146 = vmatmul.mubr.msk.bf16.vlgmr.msra.gmra.mrb[0].mxu0 %vm23_vm0, %v69_v37 }
 0x214   :  { %v120_v39 = vpop.f32.mrb[0].mxu0 }
 0x215   :  { %v121_v40 = vadd.f32 %v136_v38, %v120_v39  ;;  %v147_v41 = vpop.f32.mrb[1].mxu0 }
 0x216   :  { %v123_v42 = vpop.f32.mrb[2].mxu0 }
 0x217   :  { %128 = vst.msk [vmem:[%s230_s5] sm:$0xff] %vm127_vm2, %v121_v40  ;;  %v124_v43 = vadd.f32 %v136_v38, %v123_v42  ;;  %v148_v44 = vpop.f32.mrb[3].mxu0 }
 0x219   :  { %129 = vst.msk [vmem:[%s230_s5 + $0x8] sm:$0xff] %vm127_vm2, %v124_v43 }

// kernel: gpt_forward.12
= control target key start
LH: loop header
LB: loop body
LE: loop exit
PB: predicated region body
PF: predicated region fallthrough
CT: control target
= control target key end

     0   :  { %s1215_s12 = smov 0   ;;  %s1217_s13 = smov 0   ;;  %s1403_s0 = inlined_call_operand.vmem [shape: f32[2,8,32], index: 0, kind: input, shape index: {}]   ;;  %s1404_s1 = inlined_call_operand.vmem [shape: f32[2,8,32], index: 1, kind: input, shape index: {}]   ;;  %s1405_s2 = inlined_call_operand.vmem [shape: f32[2,8,32], index: 2, kind: input, shape index: {}]   ;;  %s1406_s3 = inlined_call_operand.vmem [shape: f32[2,8,32], index: 3, kind: output, shape index: {}]  }
   0x1   :  { %s1219_s14 = smov 0  }
   0x2 LB: > { %s32_s15 = sadd.s32 1, %s1179_s13  ;;  %p1022_p0 = scmp.ge.s32.totalorder %s1183_s14, 1  ;;  %s1183_s14 = sphi %s1219_s14, %s13_s14   ;;  %s1179_s13 = sphi %s1217_s13, %s1408_s13   ;;  %s1175_s12 = sphi %s1215_s12, %s1407_s12  }
   0x3   : > { %p34_p1 = scmp.ge.s32.totalorder %s32_s15, 2  ;;  %p190_p2 = scmp.lt.s32.totalorder %s1183_s14, 3 }
   0x5   : > { %s1410_s15 = smov (%p34_p1, %s32_s15), 0  ;;  %p191_p3 = pnand %p1022_p0, %p190_p2 }
   0x6   : > { %p232_p4 = scmp.lt.s32.totalorder (!%p191_p3), %s1175_s12, 1  ;;  %vm274_vm0 = vcmask (!%p191_p3), 64512   ;;  %v1185_v0 = vmov (!%p191_p3), 0.0   ;;  %vm1186_vm1 = vmmov (!%p191_p3), 0   ;;  %vm265_vm2 = vcmask (!%p191_p3), 7168   ;;  %s1189_s23 = smov (!%p191_p3), 120  }
   0x7   : > { %194 = sbr.rel (%p191_p3) target bundleno = 1471 (0x5bf), region = 32  ;;  %1053 = vmatprep.subr.bf16.mxu0 (!%p191_p3), %v1185_v0  ;;  %275 = vst.msk [vmem:[#allocation4] sm:$0xff] (!%p191_p3), %vm274_vm0, %v1185_v0  ;;  %276 = vst.msk [vmem:[#allocation4 + $0x8] sm:$0xff] (!%p191_p3), %vm274_vm0, %v1185_v0  ;;  %1055 = vmatprep.mubr.msk.bf16.mxu0 (!%p191_p3), %vm1186_vm1, %v1185_v0  ;;  %v1187_v6 = vmov (!%p191_p3), -1e+30   ;;  %v286_v7 = vlaneseq (!%p191_p3)  ;;  %v1188_v17 = vmov (!%p191_p3), 0  }
   0x8   : > { %277 = vst.msk [vmem:[#allocation4 + $0x10] sm:$0xff] (!%p191_p3), %vm274_vm0, %v1185_v0  ;;  %278 = vst.msk [vmem:[#allocation4 + $0x18] sm:$0xff] (!%p191_p3), %vm274_vm0, %v1185_v0  ;;  %1059 = vmatprep.subr.bf16.mxu1 (!%p191_p3), %v1185_v0  ;;  %1061 = vmatprep.mubr.msk.bf16.mxu1 (!%p191_p3), %vm1186_vm1, %v1185_v0  ;;  %s1190_s24 = smov (!%p191_p3), 112   ;;  %s1191_s25 = smov (!%p191_p3), 104   ;;  %vm385_vm4 = vcmask (!%p191_p3), 1043456   ;;  %vm905_vm5 = vcmask (!%p191_p3), 130048  }
   0x9   : > { %266 = vst.msk [vmem:[#allocation2] sm:$0xff] (!%p191_p3), %vm265_vm2, %v1187_v6  ;;  %267 = vst.msk [vmem:[#allocation2 + $0x8] sm:$0xff] (!%p191_p3), %vm265_vm2, %v1187_v6  ;;  %v1274_v8 = vshrl.u32 (!%p191_p3), %v286_v7, 7  ;;  %v1276_v9 = vand.u32 (!%p191_p3), 127, %v286_v7  ;;  %1135 = vset.pattern.permute.xlu0 (!%p191_p3), %v1188_v17  ;;  %1136 = vset.pattern.permute.xlu1 (!%p191_p3), %v1188_v17  ;;  %s1192_s29 = smov (!%p191_p3), 8   ;;  %s1193_s30 = smov (!%p191_p3), 16  }
   0xa   : > { %268 = vst.msk [vmem:[#allocation2 + $0x10] sm:$0xff] (!%p191_p3), %vm265_vm2, %v1187_v6  ;;  %269 = vst.msk [vmem:[#allocation2 + $0x18] sm:$0xff] (!%p191_p3), %vm265_vm2, %v1187_v6  ;;  %s1194_s4 = smov (!%p191_p3), 24   ;;  %vm907_vm6 = vcmask (!%p191_p3), 195584   ;;  %vm909_vm7 = vcmask (!%p191_p3), 261120  }
   0xb   : > { %270 = vst.msk [vmem:[#allocation3] sm:$0xff] (!%p191_p3), %vm265_vm2, %v1185_v0  ;;  %271 = vst.msk [vmem:[#allocation3 + $0x8] sm:$0xff] (!%p191_p3), %vm265_vm2, %v1185_v0  ;;  %vm294_vm3 = vcmp.le.s32.totalorder (!%p191_p3), %v1276_v9, %v1274_v8 }
   0xc   : > { %272 = vst.msk [vmem:[#allocation3 + $0x10] sm:$0xff] (!%p191_p3), %vm265_vm2, %v1185_v0  ;;  %273 = vst.msk [vmem:[#allocation3 + $0x18] sm:$0xff] (!%p191_p3), %vm265_vm2, %v1185_v0 }
   0xe   : > { %s1412_s12 = smov (!%p232_p4, %s1175_s12), 1 }
   0xf   : > { %s1247_s16 = sshll.u32 %s1412_s12, 3 }
  0x10   : > { %s245_s19 = scalar_lea.vmem %s1404_s1, %s1247_s16  ;;  %s238_s22 = scalar_lea.vmem %s1403_s0, %s1247_s16  ;;  %v1290_v18 = vld [vmem:[#allocation2] sm:$0xff] }
  0x11   : > { %v297_v1 = vld [vmem:[%s245_s19] sm:$0xff]  ;;  %s252_s28 = scalar_lea.vmem %s1405_s2, %s1247_s16  ;;  %v762_v9 = vld [vmem:[#allocation2 + $0x18] sm:$0xff]  ;;  %s259_s7 = scalar_lea.vmem %s1406_s3, %s1247_s16 }
  0x12   : > { %v298_v2 = vpack.c.bf16 %v297_v1, %v297_v1  ;;  %v295_v4 = vld [vmem:[%s238_s22] sm:$0xff]  ;;  %v487_v1 = vld [vmem:[#allocation2 + $0x8] sm:$0xff] }
  0x13   : > { %v296_v5 = vpack.c.bf16 %v295_v4, %v295_v4  ;;  %v299_v22 = vld [vmem:[%s252_s28] sm:$0xff] }
  0x14   : > { %v306_v3 = vsel %vm274_vm0, %v298_v2, 0  ;;  %436 = vrot.lane.b32.xlu1 %v298_v2, %s1189_s23  ;;  %v1304_v23 = vpack.c.bf16 %v299_v22, %v299_v22 }
  0x15   : > { %1054 = vmatpush3.bf16.xpose.msra.mxu0 %v306_v3 }
  0x16   : > { %1071 = vmatprep.subr.bf16.mxu0 %v1185_v0  ;;  %v387_v24 = vsel %vm385_vm4, %v1304_v23, 0 }
  0x17   : > { %1060 = vmatpush3.bf16.msra.mxu1 %v387_v24 }
  0x18   : > { %433 = vrot.lane.b32.xlu1 %v296_v5, %s1189_s23  ;;  %1065 = vmatprep.subr.bf16.mxu1 %v1185_v0 }
  0x1c   : > { %1056 = vmatmul.mubr.msk.bf16.vlgmr.msra.gmra.mrb[0].mxu0 %vm274_vm0, %v296_v5  ;;  %574 = vrot.lane.b32.xlu1 %v298_v2, %s1190_s24 }
  0x1d   : > { %1073 = vmatprep.mubr.msk.bf16.mxu0 %vm1186_vm1, %v1185_v0 }
  0x20   : > { %572 = vrot.lane.b32.xlu1 %v296_v5, %s1190_s24 }
  0x24   : > { %711 = vrot.lane.b32.xlu1 %v298_v2, %s1191_s25 }
  0x28   : > { %709 = vrot.lane.b32.xlu1 %v296_v5, %s1191_s25  ;;  %v1343_v5 = vld [vmem:[#allocation2 + $0x10] sm:$0xff] }
  0x86   : > { %v437_v28 = vpop.permute.xlu1 %436 }
  0x87   : > { %v442_v31 = vsel %vm274_vm0, %v437_v28, 0 }
  0x8a   : > { %v434_v29 = vpop.permute.xlu1 %433 }
  0x8e   : > { %v575_v33 = vpop.permute.xlu1 %574 }
  0x8f   : > { %v580_v35 = vsel %vm274_vm0, %v575_v33, 0 }
  0x92   : > { %v573_v34 = vpop.permute.xlu1 %572 }
  0x96   : > { %v712_v36 = vpop.permute.xlu1 %711 }
  0x97   : > { %v717_v37 = vsel %vm274_vm0, %v712_v36, 0 }
  0x9a   : > { %v710_v38 = vpop.permute.xlu1 %709 }
  0xef   : > { %v342_v10 = vpop.f32.mrb[0].mxu0 }
  0xf0   : > { %v348_v11 = vmul.f32 0.35355338, %v342_v10  ;;  %v1057_v12 = vpop.f32.mrb[1].mxu0 }
  0xf1   : > { %v345_v13 = vpop.f32.mrb[2].mxu0 }
  0xf2   : > { %v1058_v14 = vpop.f32.mrb[3].mxu0  ;;  %v349_v15 = vsel %vm294_vm3, %v348_v11, -1e+30 }
  0xf3   : > { %v351_v16 = vsel %vm274_vm0, %v349_v15, -inf }
  0xf4   : > { %352 = vmax.xlane.f32.xlu0 %v351_v16 }
 0x181   : > { %v353_v19 = vpop.xlane.xlu0 %352 }
 0x182   : > { %v1293_v20 = vmax.f32 %v1290_v18, %v353_v19 }
 0x184   : > { %v355_v21 = vsub.f32 %v1290_v18, %v1293_v20  ;;  %431 = vst.msk [vmem:[#allocation2] sm:$0xff] %vm265_vm2, %v1293_v20  ;;  %360 = vperm.xlu0 %1135, %v1293_v20  }
 0x203   : > { %v361_v25 = vpop.permute.xlu0 %360 }
 0x204   : > { %v363_v26 = vsub.f32 %v349_v15, %v361_v25 }
 0x206   : > { %v364_v27 = vmul.f32 1.442695, %v363_v26 }
 0x208   : > { %1137 = vpow2.f32 %v364_v27 }
 0x212   : > { %v1309_v30 = vpop.eup %1137 }
 0x213   : > { %v381_v32 = vpack.c.bf16 %v1309_v30, %v1309_v30  ;;  %v368_v13 = vsel %vm274_vm0, %v1309_v30, 0.0 }
 0x215   : > { %1062 = vmatmul.mubr.msk.bf16.vlgmr.msra.gmra.mrb[0].mxu1 %vm274_vm0, %v381_v32 }
 0x216   : > { %1066 = vmatpush3.bf16.xpose.msra.mxu1 %v442_v31  ;;  %1067 = vmatprep.mubr.msk.bf16.mxu1 %vm1186_vm1, %v1185_v0 }
 0x217   : > { %1077 = vmatprep.subr.bf16.mxu1 %v1185_v0 }
 0x21d   : > { %1068 = vmatmul.mubr.msk.bf16.vlgmr.msra.gmra.mrb[4].mxu1 %vm274_vm0, %v434_v29 }
 0x21e   : > { %1078 = vmatpush3.bf16.xpose.msra.mxu1 %v580_v35  ;;  %1079 = vmatprep.mubr.msk.bf16.mxu1 %vm1186_vm1, %v1185_v0 }
 0x21f   : > { %1089 = vmatprep.subr.bf16.mxu1 %v1185_v0 }
 0x225   : > { %1080 = vmatmul.mubr.msk.bf16.vlgmr.msra.gmra.mrb[8].mxu1 %vm274_vm0, %v573_v34 }
 0x226   : > { %1090 = vmatpush3.bf16.xpose.msra.mxu1 %v717_v37  ;;  %1091 = vmatprep.mubr.msk.bf16.mxu1 %vm1186_vm1, %v1185_v0 }
 0x22d   : > { %1092 = vmatmul.mubr.msk.bf16.vlgmr.msra.gmra.mrb[12].mxu1 %vm274_vm0, %v710_v38 }
 0x2e8   : > { %v1328_v39 = vpop.f32.mrb[0].mxu1 }
 0x2e9   : > { %v1063_v40 = vpop.f32.mrb[1].mxu1 }
 0x2ea   : > { %v426_v41 = vpop.f32.mrb[2].mxu1 }
 0x2eb   : > { %v1064_v42 = vpop.f32.mrb[3].mxu1 }
 0x2f0   : > { %v478_v43 = vpop.f32.mrb[4].mxu1 }
 0x2f1   : > { %v484_v44 = vmul.f32 0.35355338, %v478_v43  ;;  %v1069_v45 = vpop.f32.mrb[5].mxu1 }
 0x2f2   : > { %v481_v46 = vpop.f32.mrb[6].mxu1 }
 0x2f3   : > { %v1070_v47 = vpop.f32.mrb[7].mxu1  ;;  %v485_v48 = vsel %vm294_vm3, %v484_v44, -1e+30  ;;  %v356_v44 = vmul.f32 1.442695, %v355_v21  ;;  %v504_v21 = vld [vmem:[#allocation3 + $0x8] sm:$0xff] }
 0x2f4   : > { %v488_v49 = vsel %vm274_vm0, %v485_v48, -inf }
 0x2f5   : > { %489 = vmax.xlane.f32.xlu1 %v488_v49 }
 0x2f8   : > { %v616_v50 = vpop.f32.mrb[8].mxu1 }
 0x2f9   : > { %v622_v51 = vmul.f32 0.35355338, %v616_v50  ;;  %v1081_v52 = vpop.f32.mrb[9].mxu1 }
 0x2fa   : > { %v619_v53 = vpop.f32.mrb[10].mxu1 }
 0x2fb   : > { %v1082_v54 = vpop.f32.mrb[11].mxu1  ;;  %v623_v55 = vsel %vm294_vm3, %v622_v51, -1e+30 }
 0x2fc   : > { %v626_v56 = vsel %vm274_vm0, %v623_v55, -inf }
 0x2fd   : > { %627 = vmax.xlane.f32.xlu0 %v626_v56  ;;  %v642_v56 = vld [vmem:[#allocation3 + $0x10] sm:$0xff] }
 0x300   : > { %v753_v57 = vpop.f32.mrb[12].mxu1 }
 0x301   : > { %v759_v58 = vmul.f32 0.35355338, %v753_v57  ;;  %v1093_v59 = vpop.f32.mrb[13].mxu1 }
 0x302   : > { %v756_v60 = vpop.f32.mrb[14].mxu1 }
 0x303   : > { %v1094_v61 = vpop.f32.mrb[15].mxu1  ;;  %v760_v62 = vsel %vm294_vm3, %v759_v58, -1e+30 }
 0x304   : > { %v763_v63 = vsel %vm274_vm0, %v760_v62, -inf  ;;  %v779_v61 = vld [vmem:[#allocation3 + $0x18] sm:$0xff] }
 0x305   : > { %764 = vmax.xlane.f32.xlu1 %v763_v63 }
 0x382   : > { %v490_v2 = vpop.xlane.xlu1 %489 }
 0x383   : > { %v491_v3 = vmax.f32 %v487_v1, %v490_v2 }
 0x385   : > { %v492_v4 = vsub.f32 %v487_v1, %v491_v3  ;;  %571 = vst.msk [vmem:[#allocation2 + $0x8] sm:$0xff] %vm265_vm2, %v491_v3  ;;  %497 = vperm.xlu1 %1136, %v491_v3  }
 0x387   : > { %v493_v35 = vmul.f32 1.442695, %v492_v4  ;;  %v374_v4 = vld [vmem:[#allocation4] sm:$0xff] }
 0x38a   : > { %v628_v6 = vpop.xlane.xlu0 %627 }
 0x38b   : > { %v1346_v7 = vmax.f32 %v1343_v5, %v628_v6 }
 0x38d   : > { %v630_v8 = vsub.f32 %v1343_v5, %v1346_v7  ;;  %708 = vst.msk [vmem:[#allocation2 + $0x10] sm:$0xff] %vm265_vm2, %v1346_v7  ;;  %635 = vperm.xlu0 %1135, %v1346_v7  }
 0x38f   : > { %v631_v46 = vmul.f32 1.442695, %v630_v8 }
 0x392   : > { %v765_v10 = vpop.xlane.xlu1 %764 }
 0x393   : > { %v766_v11 = vmax.f32 %v762_v9, %v765_v10 }
 0x395   : > { %v767_v12 = vsub.f32 %v762_v9, %v766_v11  ;;  %845 = vst.msk [vmem:[#allocation2 + $0x18] sm:$0xff] %vm265_vm2, %v766_v11  ;;  %772 = vperm.xlu1 %1136, %v766_v11   ;;  %v512_v11 = vld [vmem:[#allocation4 + $0x8] sm:$0xff] }
 0x397   : > { %v768_v38 = vmul.f32 1.442695, %v767_v12 }
 0x399   : > { %521 = vrot.lane.b32.xlu1 %v1304_v23, %s1189_s23 }
 0x39d   : > { %658 = vrot.lane.b32.xlu1 %v1304_v23, %s1190_s24 }
 0x3a1   : > { %795 = vrot.lane.b32.xlu1 %v1304_v23, %s1191_s25 }
 0x3c5   : > { %369 = vadd.xlane.f32.xlu1 %v368_v13 }
 0x404   : > { %v498_v14 = vpop.permute.xlu1 %497 }
 0x405   : > { %v500_v15 = vsub.f32 %v485_v48, %v498_v14 }
 0x407   : > { %v501_v16 = vmul.f32 1.442695, %v500_v15 }
 0x409   : > { %1139 = vpow2.f32 %v501_v16 }
 0x40c   : > { %v636_v17 = vpop.permute.xlu0 %635 }
 0x40d   : > { %v638_v19 = vsub.f32 %v623_v55, %v636_v17 }
 0x40f   : > { %v639_v22 = vmul.f32 1.442695, %v638_v19 }
 0x411   : > { %1141 = vpow2.f32 %v639_v22  ;;  %v650_v22 = vld [vmem:[#allocation4 + $0x10] sm:$0xff] }
 0x413   : > { %v1140_v24 = vpop.eup %1139 }
 0x414   : > { %v773_v25 = vpop.permute.xlu1 %772  ;;  %v506_v26 = vsel %vm274_vm0, %v1140_v24, 0.0  ;;  %v519_v31 = vpack.c.bf16 %v1140_v24, %v1140_v24 }
 0x415   : > { %v775_v27 = vsub.f32 %v760_v62, %v773_v25  ;;  %507 = vadd.xlane.f32.xlu0 %v506_v26 }
 0x417   : > { %v776_v28 = vmul.f32 1.442695, %v775_v27 }
 0x418   : > { %v522_v23 = vpop.permute.xlu1 %521 }
 0x419   : > { %1143 = vpow2.f32 %v776_v28  ;;  %v527_v29 = vsel %vm385_vm4, %v522_v23, 0 }
 0x41a   : > { %1072 = vmatpush3.bf16.msra.mxu0 %v527_v29  ;;  %1145 = vpow2.f32 %v493_v35  ;;  %v787_v29 = vld [vmem:[#allocation4 + $0x18] sm:$0xff] }
 0x41b   : > { %v1142_v30 = vpop.eup %1141  ;;  %1083 = vmatprep.subr.bf16.mxu0 %v1185_v0  ;;  %1147 = vpow2.f32 %v768_v38 }
 0x41c   : > { %v644_v32 = vsel %vm274_vm0, %v1142_v30, 0.0  ;;  %v659_v33 = vpop.permute.xlu1 %658  ;;  %v657_v40 = vpack.c.bf16 %v1142_v30, %v1142_v30  ;;  %1149 = vpow2.f32 %v356_v44 }
 0x41d   : > { %1074 = vmatmul.mubr.msk.bf16.vlgmr.msra.gmra.mrb[4].mxu0 %vm274_vm0, %v519_v31  ;;  %645 = vadd.xlane.f32.xlu1 %v644_v32  ;;  %v664_v34 = vsel %vm385_vm4, %v659_v33, 0  ;;  %1151 = vpow2.f32 %v631_v46 }
 0x41e   : > { %1084 = vmatpush3.bf16.msra.mxu0 %v664_v34  ;;  %1085 = vmatprep.mubr.msk.bf16.mxu0 %vm1186_vm1, %v1185_v0 }
 0x41f   : > { %1095 = vmatprep.subr.bf16.mxu0 %v1185_v0 }
 0x420   : > { %v796_v36 = vpop.permute.xlu1 %795 }
 0x421   : > { %v801_v41 = vsel %vm385_vm4, %v796_v36, 0 }
 0x423   : > { %v1144_v37 = vpop.eup %1143 }
 0x424   : > { %v781_v42 = vsel %vm274_vm0, %v1144_v37, 0.0  ;;  %v794_v43 = vpack.c.bf16 %v1144_v37, %v1144_v37  ;;  %v1146_v45 = vpop.eup %1145 }
 0x425   : > { %782 = vadd.xlane.f32.xlu0 %v781_v42  ;;  %1086 = vmatmul.mubr.msk.bf16.vlgmr.msra.gmra.mrb[8].mxu0 %vm274_vm0, %v657_v40  ;;  %v1148_v47 = vpop.eup %1147  ;;  %v505_v53 = vmul.f32 %v1146_v45, %v504_v21 }
 0x426   : > { %1096 = vmatpush3.bf16.msra.mxu0 %v801_v41  ;;  %1097 = vmatprep.mubr.msk.bf16.mxu0 %vm1186_vm1, %v1185_v0  ;;  %v1150_v48 = vpop.eup %1149  ;;  %v366_v0 = vld [vmem:[#allocation3] sm:$0xff]  ;;  %v780_v62 = vmul.f32 %v1148_v47, %v779_v61 }
 0x427   : > { %v1152_v49 = vpop.eup %1151  ;;  %v367_v50 = vmul.f32 %v1150_v48, %v366_v0 }
 0x428   : > { %v643_v57 = vmul.f32 %v1152_v49, %v642_v56 }
 0x42d   : > { %1098 = vmatmul.mubr.msk.bf16.vlgmr.msra.gmra.mrb[12].mxu0 %vm274_vm0, %v794_v43 }
 0x42e   : > { %515 = vperm.xlu1 %1136, %v1146_v45  }
 0x432   : > { %790 = vperm.xlu1 %1136, %v1148_v47  }
 0x43b   : > { %377 = vperm.xlu0 %1135, %v1150_v48  }
 0x43f   : > { %653 = vperm.xlu0 %1135, %v1152_v49  }
 0x452   : > { %v370_v51 = vpop.xlane.xlu1 %369 }
 0x453   : > { %v371_v52 = vadd.f32 %v370_v51, %v367_v50 }
 0x455   : > { %373 = vst.msk [vmem:[#allocation3] sm:$0xff] %vm265_vm2, %v371_v52 }
 0x45c   : > { %v849_v18 = vld [vmem:[#allocation3] sm:$0xff] }
 0x45d   : > { %1153 = vrcp.f32 %v849_v18 }
 0x467   : > { %v1154_v20 = vpop.eup %1153 }
 0x468   : > { %854 = vperm.xlu1 %1136, %v1154_v20  }
 0x4a2   : > { %v508_v54 = vpop.xlane.xlu0 %507 }
 0x4a3   : > { %v509_v55 = vadd.f32 %v508_v54, %v505_v53 }
 0x4a5   : > { %510 = vst.msk [vmem:[#allocation3 + $0x8] sm:$0xff] %vm265_vm2, %v509_v55 }
 0x4aa   : > { %v646_v58 = vpop.xlane.xlu1 %645 }
 0x4ab   : > { %v647_v59 = vadd.f32 %v646_v58, %v643_v57 }
 0x4ac   : > { %v859_v60 = vld [vmem:[#allocation3 + $0x8] sm:$0xff] }
 0x4ad   : > { %648 = vst.msk [vmem:[#allocation3 + $0x10] sm:$0xff] %vm265_vm2, %v647_v59  ;;  %1155 = vrcp.f32 %v859_v60 }
 0x4ae   : > { %v516_v12 = vpop.permute.xlu1 %515 }
 0x4af   : > { %v518_v13 = vmul.f32 %v516_v12, %v512_v11 }
 0x4b2   : > { %v783_v63 = vpop.xlane.xlu0 %782  ;;  %v791_v30 = vpop.permute.xlu1 %790 }
 0x4b3   : > { %v784_v1 = vadd.f32 %v783_v63, %v780_v62  ;;  %v793_v31 = vmul.f32 %v791_v30, %v787_v29 }
 0x4b4   : > { %v870_v2 = vld [vmem:[#allocation3 + $0x10] sm:$0xff] }
 0x4b5   : > { %785 = vst.msk [vmem:[#allocation3 + $0x18] sm:$0xff] %vm265_vm2, %v784_v1  ;;  %1157 = vrcp.f32 %v870_v2 }
 0x4b7   : > { %v1156_v3 = vpop.eup %1155 }
 0x4b8   : > { %865 = vperm.xlu0 %1135, %v1156_v3  }
 0x4ba   : > { %v378_v5 = vpop.permute.xlu0 %377 }
 0x4bb   : > { %v380_v6 = vmul.f32 %v378_v5, %v374_v4 }
 0x4bc   : > { %v881_v7 = vld [vmem:[#allocation3 + $0x18] sm:$0xff] }
 0x4bd   : > { %v429_v8 = vadd.f32 %v1328_v39, %v380_v6  ;;  %1159 = vrcp.f32 %v881_v7 }
 0x4be   : > { %v654_v24 = vpop.permute.xlu0 %653 }
 0x4bf   : > { %v1158_v9 = vpop.eup %1157  ;;  %430 = vst.msk [vmem:[#allocation4] sm:$0xff] %vm274_vm0, %v429_v8  ;;  %v656_v39 = vmul.f32 %v654_v24, %v650_v22 }
 0x4c0   : > { %876 = vperm.xlu1 %1136, %v1158_v9  }
 0x4c6   : > { %v851_v48 = vld [vmem:[#allocation4] sm:$0xff] }
 0x4c7   : > { %v1160_v10 = vpop.eup %1159 }
 0x4c8   : > { %887 = vperm.xlu0 %1135, %v1160_v10  }
 0x4e7   : > { %v855_v41 = vpop.permute.xlu1 %854 }
 0x4e8   : > { %v857_v0 = vmul.f32 %v855_v41, %v851_v48 }
 0x4f0   : > { %v563_v14 = vpop.f32.mrb[4].mxu0 }
 0x4f1   : > { %v569_v15 = vadd.f32 %v563_v14, %v518_v13  ;;  %v1075_v16 = vpop.f32.mrb[5].mxu0 }
 0x4f2   : > { %v566_v17 = vpop.f32.mrb[6].mxu0 }
 0x4f3   : > { %570 = vst.msk [vmem:[#allocation4 + $0x8] sm:$0xff] %vm274_vm0, %v569_v15  ;;  %v1076_v19 = vpop.f32.mrb[7].mxu0 }
 0x4f8   : > { %v700_v25 = vpop.f32.mrb[8].mxu0 }
 0x4f9   : > { %v706_v26 = vadd.f32 %v700_v25, %v656_v39  ;;  %v1087_v27 = vpop.f32.mrb[9].mxu0 }
 0x4fa   : > { %v703_v28 = vpop.f32.mrb[10].mxu0  ;;  %v862_v38 = vld [vmem:[#allocation4 + $0x8] sm:$0xff] }
 0x4fb   : > { %707 = vst.msk [vmem:[#allocation4 + $0x10] sm:$0xff] %vm274_vm0, %v706_v26  ;;  %v1088_v23 = vpop.f32.mrb[11].mxu0 }
 0x500   : > { %v837_v32 = vpop.f32.mrb[12].mxu0 }
 0x501   : > { %v843_v33 = vadd.f32 %v837_v32, %v793_v31  ;;  %v1099_v34 = vpop.f32.mrb[13].mxu0 }
 0x502   : > { %v840_v35 = vpop.f32.mrb[14].mxu0  ;;  %v873_v43 = vld [vmem:[#allocation4 + $0x10] sm:$0xff] }
 0x503   : > { %844 = vst.msk [vmem:[#allocation4 + $0x18] sm:$0xff] %vm274_vm0, %v843_v33  ;;  %v1100_v36 = vpop.f32.mrb[15].mxu0 }
 0x50a   : > { %v884_v46 = vld [vmem:[#allocation4 + $0x18] sm:$0xff] }
 0x537   : > { %v866_v37 = vpop.permute.xlu0 %865 }
 0x538   : > { %v868_v40 = vmul.f32 %v866_v37, %v862_v38 }
 0x53a   : > { %892 = vrot.lane.b32.xlu1 %v868_v40, %s1192_s29 }
 0x53f   : > { %v877_v42 = vpop.permute.xlu1 %876 }
 0x540   : > { %v879_v44 = vmul.f32 %v877_v42, %v873_v43 }
 0x542   : > { %896 = vrot.lane.b32.xlu0 %v879_v44, %s1193_s30 }
 0x547   : > { %v888_v45 = vpop.permute.xlu0 %887 }
 0x548   : > { %v890_v47 = vmul.f32 %v888_v45, %v884_v46 }
 0x54a   : > { %900 = vrot.lane.b32.xlu1 %v890_v47, %s1194_s4 }
 0x5ac   : > { %v893_v49 = vpop.permute.xlu1 %892 }
 0x5ad   : > { %v904_v51 = vsel %vm274_vm0, %v857_v0, %v893_v49 }
 0x5b4   : > { %v897_v50 = vpop.permute.xlu0 %896 }
 0x5b5   : > { %v906_v52 = vsel %vm905_vm5, %v904_v51, %v897_v50 }
 0x5bc   : > { %v901_v18 = vpop.permute.xlu1 %900 }
 0x5bd   : > { %v908_v20 = vsel %vm907_vm6, %v906_v52, %v901_v18 }
 0x5be   : > { %910 = vst.msk [vmem:[%s259_s7] sm:$0xff] %vm909_vm7, %v908_v20 }
 0x5bf PF: > { %s13_s14 = sadd.s32 1, %s1183_s14   ;;  %s1407_s12 = smov %s1179_s13 }
 0x5c0   : > { %p10_p5 = scmp.ge.s32.totalorder %s13_s14, 4   ;;  %s1408_s13 = smov %s1410_s15 }
 0x5c2   :  { %12 = sbr.rel (!%p10_p5) target bundleno = 2 (0x2), region = 95 }

// kernel: gpt_forward.21
= control target key start
LH: loop header
LB: loop body
LE: loop exit
PB: predicated region body
PF: predicated region fallthrough
CT: control target
= control target key end

     0   :  { %vm21_vm0 = vcmask 261120   ;;  %s254_s0 = inlined_call_operand.vmem [shape: f32[16,32], index: 0, kind: input, shape index: {}]   ;;  %s255_s1 = inlined_call_operand.vmem [shape: f32[1,32], index: 1, kind: input, shape index: {}]   ;;  %s256_s2 = inlined_call_operand.vmem [shape: f32[1,32], index: 2, kind: input, shape index: {}]   ;;  %s257_s3 = inlined_call_operand.vmem [shape: f32[32,128], index: 3, kind: input, shape index: {}]   ;;  %s258_s4 = inlined_call_operand.hbm [shape: f32[16,128], index: 4, kind: output, shape index: {}]  }
   0x1   :  { %v19_v0 = vld [vmem:[%s254_s0] sm:$0xff]  ;;  %v20_v1 = vld [vmem:[%s254_s0 + $0x8] sm:$0xff] }
   0x2   :  { %9 = vsyncpa [#allocation3], 0  ;;  %v22_v2 = vsel %vm21_vm0, %v19_v0, 0.0  ;;  %v25_v3 = vsel %vm21_vm0, %v20_v1, 0.0  ;;  %v68_v14 = vld [vmem:[%s257_s3] sm:$0xff]  ;;  %v69_v15 = vld [vmem:[%s257_s3 + $0x8] sm:$0xff] }
   0x3   :  { %23 = vadd.xlane.f32.xlu0 %v22_v2  ;;  %v72_v16 = vpack.c.bf16 %v69_v15, %v68_v14  ;;  %v183_v17 = vmov 0.0   ;;  %v70_v18 = vld [vmem:[%s257_s3 + $0x10] sm:$0xff]  ;;  %v71_v19 = vld [vmem:[%s257_s3 + $0x18] sm:$0xff]  ;;  %vm184_vm1 = vmmov 0   ;;  %v136_v29 = vld [vmem:[%s255_s1] ss:$0 sm:$0xff] }
   0x4   :  { %142 = vmatprep.subr.bf16.mxu0 %v183_v17  ;;  %v73_v20 = vpack.c.bf16 %v71_v19, %v70_v18  ;;  %146 = vmatprep.mubr.msk.bf16.mxu0 %vm184_vm1, %v183_v17  ;;  %v137_v33 = vld [vmem:[%s256_s2] ss:$0 sm:$0xff]  ;;  %s185_s29 = smov [#allocation2]  }
   0x5   :  { %143 = vmatpush3.bf16.msra.mxu0 %v72_v16  ;;  %s125_s30 = sshll.u32 %s185_s29, 4  ;;  %s126_s30 = int_to_ptr.vmem [resolvable:$true] %s125_s30 }
   0x6   :  { %144 = vmatprep.subr.bf16.mxu0 %v183_v17  ;;  %s159_s1 = scalar_lea.vmem %s126_s30, 256  ;;  %p164_p1 = scmp.lt.s32.totalorder %s126_s30, %s126_s30 }
   0x7   :  { %26 = vadd.xlane.f32.xlu0 %v25_v3  ;;  %p160_p0 = scmp.ne.s32.totalorder %s126_s30, %s159_s1  ;;  %p165_p2 = scmp.lt.s32.totalorder %s159_s1, %s159_s1 }
   0x9   :  { %145 = vmatpush3.bf16.msra.mxu0 %v73_v20  ;;  %p166_p3 = por %p165_p2, %p164_p1 }
   0xb   :  { %p167_p4 = pnand %p166_p3, %p160_p0 }
  0x90   :  { %v24_v4 = vpop.xlane.xlu0 %23 }
  0x91   :  { %v29_v5 = vmul.f32 0.03125, %v24_v4 }
  0x93   :  { %v31_v6 = vsub.f32 %v19_v0, %v29_v5 }
  0x94   :  { %v27_v7 = vpop.xlane.xlu0 %26 }
  0x95   :  { %v30_v8 = vmul.f32 0.03125, %v27_v7  ;;  %v33_v9 = vmul.f32 %v31_v6, %v31_v6 }
  0x97   :  { %v32_v10 = vsub.f32 %v20_v1, %v30_v8  ;;  %v35_v11 = vsel %vm21_vm0, %v33_v9, 0.0 }
  0x98   :  { %36 = vadd.xlane.f32.xlu1 %v35_v11 }
  0x99   :  { %v34_v12 = vmul.f32 %v32_v10, %v32_v10 }
  0x9b   :  { %v38_v13 = vsel %vm21_vm0, %v34_v12, 0.0 }
  0x9c   :  { %39 = vadd.xlane.f32.xlu1 %v38_v13 }
 0x125   :  { %v37_v21 = vpop.xlane.xlu1 %36 }
 0x126   :  { %v41_v22 = vmul.f32 0.03125, %v37_v21 }
 0x128   :  { %v43_v23 = vadd.f32 1e-05, %v41_v22 }
 0x129   :  { %v40_v24 = vpop.xlane.xlu1 %39 }
 0x12a   :  { %155 = vrsqrt.f32 %v43_v23  ;;  %v42_v25 = vmul.f32 0.03125, %v40_v24 }
 0x12c   :  { %v44_v26 = vadd.f32 1e-05, %v42_v25 }
 0x12e   :  { %157 = vrsqrt.f32 %v44_v26 }
 0x134   :  { %v156_v27 = vpop.eup %155 }
 0x135   :  { %v47_v28 = vmul.f32 %v156_v27, %v31_v6 }
 0x137   :  { %v56_v32 = vmul.f32 %v136_v29, %v47_v28 }
 0x138   :  { %v158_v30 = vpop.eup %157 }
 0x139   :  { %v48_v31 = vmul.f32 %v158_v30, %v32_v10  ;;  %v65_v35 = vadd.f32 %v137_v33, %v56_v32 }
 0x13b   :  { %v57_v34 = vmul.f32 %v136_v29, %v48_v31 }
 0x13d   :  { %v66_v36 = vadd.f32 %v137_v33, %v57_v34 }
 0x13f   :  { %v67_v37 = vpack.c.bf16 %v66_v36, %v65_v35 }
 0x141   :  { %147 = vmatmul.mubr.msk.bf16.vlgmr.msra.gmra.mrb[0].mxu0 %vm21_vm0, %v67_v37 }
 0x214   :  { %v111_v38 = vpop.f32.mrb[0].mxu0 }
 0x215   :  { %118 = vst [vmem:[#allocation2] sm:$0xff] %v111_v38  ;;  %v148_v39 = vpop.f32.mrb[1].mxu0 }
 0x216   :  { %v114_v40 = vpop.f32.mrb[2].mxu0 }
 0x217   :  { %119 = vst [vmem:[#allocation2 + $0x8] sm:$0xff] %v114_v40  ;;  %v149_v41 = vpop.f32.mrb[3].mxu0 }
 0x218   :  { %170 = shalt.err (!%p167_p4)
}
 0x219   :  { %s171_s6 = scalar_lea.hbm %s258_s4, 256 }
 0x21a   :  { %p172_p5 = scmp.ne.s32.totalorder %s258_s4, %s171_s6  ;;  %p175_p6 = scmp.lt.u32.totalorder %s171_s6, %s258_s4 }
 0x21c   :  { %p177_p7 = pnand %p175_p6, %p172_p5 }
 0x21e   :  { %180 = shalt.err (!%p177_p7)
}
 0x21f   :  { %s186_s11 = smov 128   ;;  %s187_s12 = smov 8  }
 0x220   :  { %131 = dma.vmem_to_hbm [thread:$0]  %s126_s30, 256, %s258_s4, [#allocation3], %s186_s11, %s186_s11, %s187_s12  }
 0x221   :  { %181 = dma.done.wait [#allocation3], 256  }
 0x222   :  { %182 = vsyncadd [#allocation3], 4294967040 }
 0x223   :  { %135 = vsyncpa [#allocation3], 1 }

// kernel: gpt_forward.15
= control target key start
LH: loop header
LB: loop body
LE: loop exit
PB: predicated region body
PF: predicated region fallthrough
CT: control target
= control target key end

     0   :  { %vm19_vm0 = vcmask 261120   ;;  %v149_v0 = vmov 0.0   ;;  %vm150_vm1 = vmmov 0   ;;  %s240_s1 = inlined_call_operand.vmem [shape: f32[128,32], index: 1, kind: input, shape index: {}]   ;;  %s241_s0 = inlined_call_operand.vmem [shape: f32[16,128], index: 0, kind: input, shape index: {}]   ;;  %s242_s2 = inlined_call_operand.vmem [shape: f32[1,32], index: 2, kind: input, shape index: {}]   ;;  %s243_s3 = inlined_call_operand.vmem [shape: f32[16,32], index: 3, kind: output, shape index: {}]  }
   0x1   :  { %127 = vmatprep.subr.bf16.mxu0 %v149_v0  ;;  %v27_v1 = vld [vmem:[%s240_s1] sm:$0xff]  ;;  %v28_v2 = vld [vmem:[%s240_s1 + $0x8] sm:$0xff]  ;;  %v29_v3 = vld [vmem:[%s240_s1 + $0x10] sm:$0xff]  ;;  %143 = vmatprep.mubr.msk.bf16.mxu0 %vm150_vm1, %v149_v0  ;;  %20 = vst.msk [vmem:[#allocation2] sm:$0xff] %vm19_vm0, %v149_v0 }
   0x2   :  { %21 = vst.msk [vmem:[#allocation2 + $0x8] sm:$0xff] %vm19_vm0, %v149_v0  ;;  %v43_v4 = vpack.c.bf16 %v28_v2, %v27_v1  ;;  %v30_v5 = vld [vmem:[%s240_s1 + $0x18] sm:$0xff]  ;;  %v31_v7 = vld [vmem:[%s240_s1 + $0x20] sm:$0xff]  ;;  %v32_v8 = vld [vmem:[%s240_s1 + $0x28] sm:$0xff] }
   0x3   :  { %v44_v6 = vpack.c.bf16 %v30_v5, %v29_v3  ;;  %v45_v9 = vpack.c.bf16 %v32_v8, %v31_v7  ;;  %v33_v10 = vld [vmem:[%s240_s1 + $0x30] sm:$0xff]  ;;  %v34_v11 = vld [vmem:[%s240_s1 + $0x38] sm:$0xff]  ;;  %v35_v13 = vld [vmem:[%s240_s1 + $0x40] sm:$0xff] }
   0x4   :  { %128 = vmatpush3.bf16.msra.mxu0 %v43_v4  ;;  %v46_v12 = vpack.c.bf16 %v34_v11, %v33_v10  ;;  %v36_v14 = vld [vmem:[%s240_s1 + $0x48] sm:$0xff]  ;;  %v37_v16 = vld [vmem:[%s240_s1 + $0x50] sm:$0xff]  ;;  %v38_v17 = vld [vmem:[%s240_s1 + $0x58] sm:$0xff] }
   0x5   :  { %129 = vmatprep.subr.bf16.mxu0 %v149_v0  ;;  %v47_v15 = vpack.c.bf16 %v36_v14, %v35_v13  ;;  %v48_v18 = vpack.c.bf16 %v38_v17, %v37_v16  ;;  %v39_v19 = vld [vmem:[%s240_s1 + $0x60] sm:$0xff]  ;;  %v40_v20 = vld [vmem:[%s240_s1 + $0x68] sm:$0xff]  ;;  %v41_v22 = vld [vmem:[%s240_s1 + $0x70] sm:$0xff] }
   0x6   :  { %v49_v21 = vpack.c.bf16 %v40_v20, %v39_v19  ;;  %v42_v23 = vld [vmem:[%s240_s1 + $0x78] sm:$0xff]  ;;  %v24_v25 = vld [vmem:[%s241_s0] sm:$0xff]  ;;  %v25_v26 = vld [vmem:[%s241_s0 + $0x8] sm:$0xff] }
   0x7   :  { %v50_v24 = vpack.c.bf16 %v42_v23, %v41_v22  ;;  %v26_v27 = vpack.c.bf16 %v25_v26, %v24_v25  ;;  %v117_v36 = vld [vmem:[%s242_s2] ss:$0 sm:$0xff] }
   0x8   :  { %130 = vmatpush3.bf16.msra.mxu0 %v44_v6  ;;  %v22_v28 = vld [vmem:[#allocation2] sm:$0xff] }
   0x9   :  { %131 = vmatprep.subr.bf16.mxu0 %v149_v0  ;;  %v23_v30 = vld [vmem:[#allocation2 + $0x8] sm:$0xff] }
   0xc   :  { %132 = vmatpush3.bf16.msra.mxu0 %v45_v9 }
   0xd   :  { %133 = vmatprep.subr.bf16.mxu0 %v149_v0 }
  0x10   :  { %134 = vmatpush3.bf16.msra.mxu0 %v46_v12 }
  0x11   :  { %135 = vmatprep.subr.bf16.mxu0 %v149_v0 }
  0x14   :  { %136 = vmatpush3.bf16.msra.mxu0 %v47_v15 }
  0x15   :  { %137 = vmatprep.subr.bf16.mxu0 %v149_v0 }
  0x18   :  { %138 = vmatpush3.bf16.msra.mxu0 %v48_v18 }
  0x19   :  { %139 = vmatprep.subr.bf16.mxu0 %v149_v0 }
  0x1c   :  { %140 = vmatpush3.bf16.msra.mxu0 %v49_v21 }
  0x1d   :  { %141 = vmatprep.subr.bf16.mxu0 %v149_v0 }
  0x20   :  { %142 = vmatpush3.bf16.msra.mxu0 %v50_v24 }
  0x23   :  { %144 = vmatmul.mubr.bf16.vlgmr.msra.gmra.mrb[0].mxu0 %v26_v27 }
  0xf6   :  { %v85_v29 = vpop.f32.mrb[0].mxu0 }
  0xf7   :  { %v92_v31 = vadd.f32 %v85_v29, %v22_v28  ;;  %v145_v32 = vpop.f32.mrb[1].mxu0 }
  0xf8   :  { %v88_v33 = vpop.f32.mrb[2].mxu0 }
  0xf9   :  { %95 = vst.msk [vmem:[#allocation2] sm:$0xff] %vm19_vm0, %v92_v31  ;;  %v93_v34 = vadd.f32 %v88_v33, %v23_v30  ;;  %v146_v35 = vpop.f32.mrb[3].mxu0 }
  0xfb   :  { %96 = vst.msk [vmem:[#allocation2 + $0x8] sm:$0xff] %vm19_vm0, %v93_v34 }
 0x100   :  { %v100_v37 = vld [vmem:[#allocation2] sm:$0xff] }
 0x101   :  { %v109_v38 = vadd.f32 %v117_v36, %v100_v37 }
 0x102   :  { %v101_v39 = vld [vmem:[#allocation2 + $0x8] sm:$0xff] }
 0x103   :  { %111 = vst.msk [vmem:[%s243_s3] sm:$0xff] %vm19_vm0, %v109_v38  ;;  %v110_v40 = vadd.f32 %v117_v36, %v101_v39 }
 0x105   :  { %112 = vst.msk [vmem:[%s243_s3 + $0x8] sm:$0xff] %vm19_vm0, %v110_v40 }

</bundles_post_ra>
